<compile_context>
chip_gen: v5e
topology: v5e:2x2
jax: 0.10.0
libtpu: 0.0.40
codegen_flags: <defaults>
</compile_context>

<pallas_src>
import jax
import jax.numpy as jnp
from jax.experimental import pallas as pl
from jax.experimental.pallas import tpu as pltpu


def _make_reg_head_kernel(num_levels):
    """Build the kernel for `num_levels` FPN levels, all handled in one call.

    Ref order (inputs then outputs):
      x_0..x_{L-1}   : (1, Cin, Tp_l)    per-level features (float, cast in-kernel)
      m_0..m_{L-1}   : (1, 2, Tp_l)      rows = [mask, mask * scale_l], f32
      w1, b1         : (3, Cf, Cin) bf16 / (Cf, 1) f32      head conv 0
      w2, b2         : (3, Cf, Cf)  bf16 / (Cf, 1) f32      head conv 1
      w3, b3         : (3, Co, Cf)  bf16 / (Co, 1) f32      offset head
      o_0..o_{L-1}   : (1, Co, Tp_l) f32 outputs
    """
    L = num_levels

    def kernel(*refs):
        x_refs = refs[0:L]
        m_refs = refs[L:2 * L]
        w1_ref, b1_ref, w2_ref, b2_ref, w3_ref, b3_ref = refs[2 * L:2 * L + 6]
        o_refs = refs[2 * L + 6:]

        def conv3(h, w_ref, b_ref, not_first, not_last, roll_inputs):
            # out[:, t] = W0 @ h[:, t-1] + W1 @ h[:, t] + W2 @ h[:, t+1] + b
            # Three adjacent MXU matmuls accumulate into ONE (Cout, T) f32 slab
            # (no (3*Cout, T) intermediate).  Shifts via pltpu.roll (XLU) + a
            # cheap edge select; `roll_inputs` picks the cheaper side to shift.
            tl = h.shape[-1]
            h_bf = h.astype(jnp.bfloat16)
            acc = jnp.dot(w_ref[1], h_bf, preferred_element_type=jnp.float32)
            if roll_inputs:
                h_prev = jnp.where(not_first, pltpu.roll(h, shift=1, axis=1),
                                   0.0).astype(jnp.bfloat16)
                acc = acc + jnp.dot(w_ref[0], h_prev,
                                    preferred_element_type=jnp.float32)
                h_next = jnp.where(not_last,
                                   pltpu.roll(h, shift=tl - 1, axis=1),
                                   0.0).astype(jnp.bfloat16)
                acc = acc + jnp.dot(w_ref[2], h_next,
                                    preferred_element_type=jnp.float32)
            else:
                y0 = jnp.dot(w_ref[0], h_bf, preferred_element_type=jnp.float32)
                acc = acc + jnp.where(not_first,
                                      pltpu.roll(y0, shift=1, axis=1), 0.0)
                y2 = jnp.dot(w_ref[2], h_bf, preferred_element_type=jnp.float32)
                acc = acc + jnp.where(not_last,
                                      pltpu.roll(y2, shift=tl - 1, axis=1), 0.0)
            return acc + b_ref[...]

        for l in range(L):                      # static unroll over FPN levels
            x = x_refs[l][0]                    # (Cin, Tp) float
            mm = m_refs[l][0]                   # (2, Tp) f32
            m = mm[0:1, :]                      # mask
            ms = mm[1:2, :]                     # mask * scale_l (folded epilogue)
            tl = x.shape[-1]
            col = jax.lax.broadcasted_iota(jnp.int32, (1, tl), 1)
            not_first = col != 0                # zero the wrapped column of tap t-1
            not_last = col != tl - 1            # zero the wrapped column of tap t+1

            # head conv 0 + Identity norm + ReLU (mask applied to conv output)
            h = jnp.maximum(conv3(x, w1_ref, b1_ref, not_first, not_last, True) * m, 0.0)
            # head conv 1 + Identity norm + ReLU
            h = jnp.maximum(conv3(h, w2_ref, b2_ref, not_first, not_last, True) * m, 0.0)
            # offset head (Cout=34 << Cin -> shift the small output side)
            off = conv3(h, w3_ref, b3_ref, not_first, not_last, False)
            # relu(scale * (conv * mask)) == relu(conv * (mask * scale))
            o_refs[l][0] = jnp.maximum(off * ms, 0.0)

    return kernel


def pt_transformer_reg_head(fpn_feats, fpn_masks, params):
    """Full forward.

    fpn_feats: list of (B, C, T_l) arrays (PyTorch NCT convention).
    fpn_masks: list of (B, 1, T_l) boolean arrays.
    Returns tuple of (B, 2*(num_bins+1), T_l) f32 arrays (NCT).
    """
    assert len(fpn_feats) == len(fpn_masks)
    L = len(fpn_feats)
    B, cin, _ = fpn_feats[0].shape
    ts = [int(f.shape[2]) for f in fpn_feats]
    tps = [max(128, ((t + 127) // 128) * 128) for t in ts]   # lane-aligned per level

    cf = params["w1"].shape[1]
    out_dim = params["w3"].shape[1]

    # Shared conv weights -> bf16 for the MXU; biases stay f32.
    w1 = params["w1"].astype(jnp.bfloat16)
    w2 = params["w2"].astype(jnp.bfloat16)
    w3 = params["w3"].astype(jnp.bfloat16)
    b1 = params["b1"].reshape(cf, 1).astype(jnp.float32)
    b2 = params["b2"].reshape(cf, 1).astype(jnp.float32)
    b3 = params["b3"].reshape(out_dim, 1).astype(jnp.float32)

    xs, ms = [], []
    for l in range(L):
        x = fpn_feats[l]                                        # kept in its dtype
        m = fpn_masks[l].astype(jnp.float32)                    # (B, 1, T_l)
        s = params["scales"][l].reshape(()).astype(jnp.float32)
        m2 = jnp.concatenate([m, m * s], axis=1)                # (B, 2, T_l)
        if tps[l] != ts[l]:                                     # zero lane padding
            x = jnp.pad(x, ((0, 0), (0, 0), (0, tps[l] - ts[l])))
            m2 = jnp.pad(m2, ((0, 0), (0, 0), (0, tps[l] - ts[l])))
        xs.append(x)
        ms.append(m2)

    in_specs = (
        [pl.BlockSpec((1, cin, tp), lambda b: (b, 0, 0)) for tp in tps]
        + [pl.BlockSpec((1, 2, tp), lambda b: (b, 0, 0)) for tp in tps]
        + [pl.BlockSpec((3, cf, cin), lambda b: (0, 0, 0)),
           pl.BlockSpec((cf, 1), lambda b: (0, 0)),
           pl.BlockSpec((3, cf, cf), lambda b: (0, 0, 0)),
           pl.BlockSpec((cf, 1), lambda b: (0, 0)),
           pl.BlockSpec((3, out_dim, cf), lambda b: (0, 0, 0)),
           pl.BlockSpec((out_dim, 1), lambda b: (0, 0))])
    out_specs = [pl.BlockSpec((1, out_dim, tp), lambda b: (b, 0, 0)) for tp in tps]
    out_shape = [jax.ShapeDtypeStruct((B, out_dim, tp), jnp.float32) for tp in tps]

    flops = 2 * 3 * B * sum(tps) * (cin * cf + cf * cf + cf * out_dim)
    bytes_accessed = (sum(int(x.size) * x.dtype.itemsize for x in xs)
                      + sum(int(m.size) * 4 for m in ms)
                      + 2 * (int(w1.size) + int(w2.size) + int(w3.size))
                      + 4 * (int(b1.size) + int(b2.size) + int(b3.size))
                      + sum(B * out_dim * tp * 4 for tp in tps))

    outs = pl.pallas_call(
        _make_reg_head_kernel(L),
        grid=(B,),
        in_specs=in_specs,
        out_specs=out_specs,
        out_shape=out_shape,
        compiler_params=pltpu.CompilerParams(
            dimension_semantics=("parallel",),
            vmem_limit_bytes=64 * 1024 * 1024),
        cost_estimate=pl.CostEstimate(flops=int(flops), transcendentals=0,
                                      bytes_accessed=int(bytes_accessed)),
    )(*xs, *ms, w1, b1, w2, b2, w3, b3)

    # Drop lane padding (no-op for levels whose T is already a multiple of 128).
    return tuple(outs[l][:, :, :ts[l]] for l in range(L))


def init_params(key, input_dim, feat_dim, num_bins, fpn_levels):
    out_dim = 2 * (num_bins + 1)
    ks = jax.random.split(key, 6)

    def conv_w(k, cout, cin):
        # stored as (tap=3, Cout, Cin); tap order = (t-1, t, t+1)
        fan_in = cin * 3
        return (jax.random.normal(k, (3, cout, cin), jnp.float32)
                / jnp.sqrt(jnp.float32(fan_in)))

    return {
        "w1": conv_w(ks[0], feat_dim, input_dim),
        "b1": 0.01 * jax.random.normal(ks[1], (feat_dim,), jnp.float32),
        "w2": conv_w(ks[2], feat_dim, feat_dim),
        "b2": 0.01 * jax.random.normal(ks[3], (feat_dim,), jnp.float32),
        "w3": conv_w(ks[4], out_dim, feat_dim),
        "b3": 0.01 * jax.random.normal(ks[5], (out_dim,), jnp.float32),
        # Scale() initializes its scalar to 1.0
        "scales": [jnp.ones((1, 1), jnp.float32) for _ in range(fpn_levels)],
    }


# ----------------------- pure-JAX reference (for checking) -----------------------
def _bf16_round(a):
    return a.astype(jnp.bfloat16).astype(jnp.float32)


def _ref_masked_conv(x, m, w, b):
    # x: (B, Cin, T) f32; w: (3, Cout, Cin) f32; b: (Cout,) f32; m: (B, 1, T) f32
    xp = jnp.pad(x, ((0, 0), (0, 0), (1, 1)))
    hi = jax.lax.Precision.HIGHEST
    y = (jnp.einsum("oc,bct->bot", w[0], xp[:, :, :-2], precision=hi)
         + jnp.einsum("oc,bct->bot", w[1], xp[:, :, 1:-1], precision=hi)
         + jnp.einsum("oc,bct->bot", w[2], xp[:, :, 2:], precision=hi))
    return (y + b[None, :, None]) * m


def reference_forward(fpn_feats, fpn_masks, params):
    outs = []
    for l, (x, mk) in enumerate(zip(fpn_feats, fpn_masks)):
        m = mk.astype(jnp.float32)
        h = _bf16_round(x.astype(jnp.float32))
        h = jnp.maximum(
            _ref_masked_conv(h, m, _bf16_round(params["w1"]), params["b1"]), 0.0)
        h = jnp.maximum(
            _ref_masked_conv(_bf16_round(h), m, _bf16_round(params["w2"]), params["b2"]), 0.0)
        off = _ref_masked_conv(_bf16_round(h), m, _bf16_round(params["w3"]), params["b3"])
        outs.append(jnp.maximum(off * params["scales"][l].reshape(()), 0.0))
    return tuple(outs)


if __name__ == "__main__":
    # Small config consistent with the module
    B = 2
    input_dim = 32
    feat_dim = 32
    num_bins = 16          # -> 2 * (16 + 1) = 34 output channels
    fpn_levels = 2
    Ts = [128, 64]         # level 0 lane-aligned, level 1 exercises the pad path

    key = jax.random.PRNGKey(0)
    kp, kf = jax.random.split(key)
    params = init_params(kp, input_dim, feat_dim, num_bins, fpn_levels)
    # non-trivial per-level scales so the fused mask*scale path is exercised
    params["scales"] = [jnp.full((1, 1), 1.0 + 0.5 * l, jnp.float32)
                        for l in range(fpn_levels)]

    fpn_feats, fpn_masks = [], []
    fkeys = jax.random.split(kf, fpn_levels)
    for l, T in enumerate(Ts):
        fpn_feats.append(jax.random.normal(fkeys[l], (B, input_dim, T), jnp.float32))
        # valid lengths: full for batch 0, half for batch 1
        t_idx = jnp.arange(T)[None, None, :]
        lens = jnp.array([T, T // 2])[:, None, None]
        fpn_masks.append(t_idx < lens)          # (B, 1, T) bool

    outs = pt_transformer_reg_head(fpn_feats, fpn_masks, params)
    outs = jax.block_until_ready(outs)
    refs = reference_forward(fpn_feats, fpn_masks, params)

    out_dim = 2 * (num_bins + 1)
    for l, (o, r) in enumerate(zip(outs, refs)):
        assert o.shape == (B, out_dim, Ts[l]), o.shape
        assert bool(jnp.all(o >= 0.0))                       # final ReLU
        err = float(jnp.max(jnp.abs(o - r)))
        assert err < 2e-2, (l, err)

    print("KERNEL_OK")
</pallas_src>

<mosaic_0001>
module attributes {stable_mosaic.version = 11 : i64} {
  func.func @kernel(%arg0: i32, %arg1: memref<1x32x128xf32, #tpu.memory_space<vmem>>, %arg2: memref<1x32x128xf32, #tpu.memory_space<vmem>>, %arg3: memref<1x2x128xf32, #tpu.memory_space<vmem>>, %arg4: memref<1x2x128xf32, #tpu.memory_space<vmem>>, %arg5: memref<3x32x32xbf16, #tpu.memory_space<vmem>>, %arg6: memref<32x1xf32, #tpu.memory_space<vmem>>, %arg7: memref<3x32x32xbf16, #tpu.memory_space<vmem>>, %arg8: memref<32x1xf32, #tpu.memory_space<vmem>>, %arg9: memref<3x34x32xbf16, #tpu.memory_space<vmem>>, %arg10: memref<34x1xf32, #tpu.memory_space<vmem>>, %arg11: memref<1x34x128xf32, #tpu.memory_space<vmem>>, %arg12: memref<1x34x128xf32, #tpu.memory_space<vmem>>) attributes {dimension_semantics = [#tpu.dimension_semantics<parallel>], iteration_bounds = array<i64: 2>, scalar_prefetch = 0 : i64, scratch_operands = 0 : i64, tpu.core_type = #tpu.core_type<tc>, window_params = [{transform_indices = @transform_0, window_bounds = array<i64: 1, 32, 128>}, {transform_indices = @transform_1, window_bounds = array<i64: 1, 32, 128>}, {transform_indices = @transform_2, window_bounds = array<i64: 1, 2, 128>}, {transform_indices = @transform_3, window_bounds = array<i64: 1, 2, 128>}, {pipeline_mode = #tpu.pipeline_mode<synchronous>, transform_indices = @transform_4, window_bounds = array<i64: 3, 32, 32>}, {pipeline_mode = #tpu.pipeline_mode<synchronous>, transform_indices = @transform_5, window_bounds = array<i64: 32, 1>}, {pipeline_mode = #tpu.pipeline_mode<synchronous>, transform_indices = @transform_6, window_bounds = array<i64: 3, 32, 32>}, {pipeline_mode = #tpu.pipeline_mode<synchronous>, transform_indices = @transform_7, window_bounds = array<i64: 32, 1>}, {pipeline_mode = #tpu.pipeline_mode<synchronous>, transform_indices = @transform_8, window_bounds = array<i64: 3, 34, 32>}, {pipeline_mode = #tpu.pipeline_mode<synchronous>, transform_indices = @transform_9, window_bounds = array<i64: 34, 1>}, {transform_indices = @transform_10, window_bounds = array<i64: 1, 34, 128>}, {transform_indices = @transform_11, window_bounds = array<i64: 1, 34, 128>}]} {
    %c0 = arith.constant 0 : index
    %c0_0 = arith.constant 0 : index
    %c0_1 = arith.constant 0 : index
    %0 = vector.load %arg1[%c0, %c0_0, %c0_1] : memref<1x32x128xf32, #tpu.memory_space<vmem>>, vector<1x32x128xf32>
    %1 = vector.shape_cast %0 : vector<1x32x128xf32> to vector<32x128xf32>
    %c0_2 = arith.constant 0 : index
    %c0_3 = arith.constant 0 : index
    %c0_4 = arith.constant 0 : index
    %2 = vector.load %arg3[%c0_2, %c0_3, %c0_4] : memref<1x2x128xf32, #tpu.memory_space<vmem>>, vector<1x2x128xf32>
    %3 = vector.shape_cast %2 : vector<1x2x128xf32> to vector<2x128xf32>
    %4 = vector.extract_strided_slice %3 {offsets = [0, 0], sizes = [1, 128], strides = [1, 1]} : vector<2x128xf32> to vector<1x128xf32>
    %5 = vector.extract_strided_slice %3 {offsets = [1, 0], sizes = [1, 128], strides = [1, 1]} : vector<2x128xf32> to vector<1x128xf32>
    %6 = tpu.iota {dimensions = array<i32: 1>} : vector<1x128xi32>
    %c0_i32 = arith.constant 0 : i32
    %7 = vector.broadcast %c0_i32 : i32 to vector<1x128xi32>
    %8 = arith.cmpi ne, %6, %7 : vector<1x128xi32>
    %c127_i32 = arith.constant 127 : i32
    %9 = vector.broadcast %c127_i32 : i32 to vector<1x128xi32>
    %10 = arith.cmpi ne, %6, %9 : vector<1x128xi32>
    %11 = arith.truncf %1 : vector<32x128xf32> to vector<32x128xbf16>
    %c1 = arith.constant 1 : index
    %c0_5 = arith.constant 0 : index
    %c0_6 = arith.constant 0 : index
    %12 = vector.load %arg5[%c1, %c0_5, %c0_6] : memref<3x32x32xbf16, #tpu.memory_space<vmem>>, vector<1x32x32xbf16>
    %13 = vector.shape_cast %12 : vector<1x32x32xbf16> to vector<32x32xbf16>
    %cst = arith.constant dense<0.000000e+00> : vector<32x128xf32>
    %14 = tpu.matmul %13, %11, %cst {dimension_numbers = #tpu.dot_dimension_numbers<[1], [0], [0], [1], [0, 0, 1, 1], [], []>} : vector<32x32xbf16>, vector<32x128xbf16>, vector<32x128xf32> -> vector<32x128xf32>
    %c1_i32 = arith.constant 1 : i32
    %15 = tpu.dynamic_rotate %1 by %c1_i32 dim 1 : vector<32x128xf32>, i32 -> vector<32x128xf32>
    %cst_7 = arith.constant 0.000000e+00 : f32
    %16 = vector.shape_cast %8 : vector<1x128xi1> to vector<1x128xi1>
    %17 = vector.broadcast %16 : vector<1x128xi1> to vector<32x128xi1>
    %18 = vector.broadcast %cst_7 : f32 to vector<32x128xf32>
    %19 = arith.select %17, %15, %18 : vector<32x128xi1>, vector<32x128xf32>
    %20 = arith.truncf %19 : vector<32x128xf32> to vector<32x128xbf16>
    %c0_8 = arith.constant 0 : index
    %c0_9 = arith.constant 0 : index
    %c0_10 = arith.constant 0 : index
    %21 = vector.load %arg5[%c0_8, %c0_9, %c0_10] : memref<3x32x32xbf16, #tpu.memory_space<vmem>>, vector<1x32x32xbf16>
    %22 = vector.shape_cast %21 : vector<1x32x32xbf16> to vector<32x32xbf16>
    %cst_11 = arith.constant dense<0.000000e+00> : vector<32x128xf32>
    %23 = tpu.matmul %22, %20, %cst_11 {dimension_numbers = #tpu.dot_dimension_numbers<[1], [0], [0], [1], [0, 0, 1, 1], [], []>} : vector<32x32xbf16>, vector<32x128xbf16>, vector<32x128xf32> -> vector<32x128xf32>
    %24 = arith.addf %14, %23 : vector<32x128xf32>
    %c127_i32_12 = arith.constant 127 : i32
    %25 = tpu.dynamic_rotate %1 by %c127_i32_12 dim 1 : vector<32x128xf32>, i32 -> vector<32x128xf32>
    %cst_13 = arith.constant 0.000000e+00 : f32
    %26 = vector.shape_cast %10 : vector<1x128xi1> to vector<1x128xi1>
    %27 = vector.broadcast %26 : vector<1x128xi1> to vector<32x128xi1>
    %28 = vector.broadcast %cst_13 : f32 to vector<32x128xf32>
    %29 = arith.select %27, %25, %28 : vector<32x128xi1>, vector<32x128xf32>
    %30 = arith.truncf %29 : vector<32x128xf32> to vector<32x128xbf16>
    %c2 = arith.constant 2 : index
    %c0_14 = arith.constant 0 : index
    %c0_15 = arith.constant 0 : index
    %31 = vector.load %arg5[%c2, %c0_14, %c0_15] : memref<3x32x32xbf16, #tpu.memory_space<vmem>>, vector<1x32x32xbf16>
    %32 = vector.shape_cast %31 : vector<1x32x32xbf16> to vector<32x32xbf16>
    %cst_16 = arith.constant dense<0.000000e+00> : vector<32x128xf32>
    %33 = tpu.matmul %32, %30, %cst_16 {dimension_numbers = #tpu.dot_dimension_numbers<[1], [0], [0], [1], [0, 0, 1, 1], [], []>} : vector<32x32xbf16>, vector<32x128xbf16>, vector<32x128xf32> -> vector<32x128xf32>
    %34 = arith.addf %24, %33 : vector<32x128xf32>
    %c0_17 = arith.constant 0 : index
    %c0_18 = arith.constant 0 : index
    %35 = vector.load %arg6[%c0_17, %c0_18] : memref<32x1xf32, #tpu.memory_space<vmem>>, vector<32x1xf32>
    %36 = vector.broadcast %35 : vector<32x1xf32> to vector<32x128xf32>
    %37 = arith.addf %34, %36 : vector<32x128xf32>
    %38 = vector.broadcast %4 : vector<1x128xf32> to vector<32x128xf32>
    %39 = arith.mulf %37, %38 : vector<32x128xf32>
    %cst_19 = arith.constant 0.000000e+00 : f32
    %40 = vector.broadcast %cst_19 : f32 to vector<32x128xf32>
    %41 = arith.maximumf %39, %40 : vector<32x128xf32>
    %42 = arith.truncf %41 : vector<32x128xf32> to vector<32x128xbf16>
    %c1_20 = arith.constant 1 : index
    %c0_21 = arith.constant 0 : index
    %c0_22 = arith.constant 0 : index
    %43 = vector.load %arg7[%c1_20, %c0_21, %c0_22] : memref<3x32x32xbf16, #tpu.memory_space<vmem>>, vector<1x32x32xbf16>
    %44 = vector.shape_cast %43 : vector<1x32x32xbf16> to vector<32x32xbf16>
    %cst_23 = arith.constant dense<0.000000e+00> : vector<32x128xf32>
    %45 = tpu.matmul %44, %42, %cst_23 {dimension_numbers = #tpu.dot_dimension_numbers<[1], [0], [0], [1], [0, 0, 1, 1], [], []>} : vector<32x32xbf16>, vector<32x128xbf16>, vector<32x128xf32> -> vector<32x128xf32>
    %c1_i32_24 = arith.constant 1 : i32
    %46 = tpu.dynamic_rotate %41 by %c1_i32_24 dim 1 : vector<32x128xf32>, i32 -> vector<32x128xf32>
    %cst_25 = arith.constant 0.000000e+00 : f32
    %47 = vector.shape_cast %8 : vector<1x128xi1> to vector<1x128xi1>
    %48 = vector.broadcast %47 : vector<1x128xi1> to vector<32x128xi1>
    %49 = vector.broadcast %cst_25 : f32 to vector<32x128xf32>
    %50 = arith.select %48, %46, %49 : vector<32x128xi1>, vector<32x128xf32>
    %51 = arith.truncf %50 : vector<32x128xf32> to vector<32x128xbf16>
    %c0_26 = arith.constant 0 : index
    %c0_27 = arith.constant 0 : index
    %c0_28 = arith.constant 0 : index
    %52 = vector.load %arg7[%c0_26, %c0_27, %c0_28] : memref<3x32x32xbf16, #tpu.memory_space<vmem>>, vector<1x32x32xbf16>
    %53 = vector.shape_cast %52 : vector<1x32x32xbf16> to vector<32x32xbf16>
    %cst_29 = arith.constant dense<0.000000e+00> : vector<32x128xf32>
    %54 = tpu.matmul %53, %51, %cst_29 {dimension_numbers = #tpu.dot_dimension_numbers<[1], [0], [0], [1], [0, 0, 1, 1], [], []>} : vector<32x32xbf16>, vector<32x128xbf16>, vector<32x128xf32> -> vector<32x128xf32>
    %55 = arith.addf %45, %54 : vector<32x128xf32>
    %c127_i32_30 = arith.constant 127 : i32
    %56 = tpu.dynamic_rotate %41 by %c127_i32_30 dim 1 : vector<32x128xf32>, i32 -> vector<32x128xf32>
    %cst_31 = arith.constant 0.000000e+00 : f32
    %57 = vector.shape_cast %10 : vector<1x128xi1> to vector<1x128xi1>
    %58 = vector.broadcast %57 : vector<1x128xi1> to vector<32x128xi1>
    %59 = vector.broadcast %cst_31 : f32 to vector<32x128xf32>
    %60 = arith.select %58, %56, %59 : vector<32x128xi1>, vector<32x128xf32>
    %61 = arith.truncf %60 : vector<32x128xf32> to vector<32x128xbf16>
    %c2_32 = arith.constant 2 : index
    %c0_33 = arith.constant 0 : index
    %c0_34 = arith.constant 0 : index
    %62 = vector.load %arg7[%c2_32, %c0_33, %c0_34] : memref<3x32x32xbf16, #tpu.memory_space<vmem>>, vector<1x32x32xbf16>
    %63 = vector.shape_cast %62 : vector<1x32x32xbf16> to vector<32x32xbf16>
    %cst_35 = arith.constant dense<0.000000e+00> : vector<32x128xf32>
    %64 = tpu.matmul %63, %61, %cst_35 {dimension_numbers = #tpu.dot_dimension_numbers<[1], [0], [0], [1], [0, 0, 1, 1], [], []>} : vector<32x32xbf16>, vector<32x128xbf16>, vector<32x128xf32> -> vector<32x128xf32>
    %65 = arith.addf %55, %64 : vector<32x128xf32>
    %c0_36 = arith.constant 0 : index
    %c0_37 = arith.constant 0 : index
    %66 = vector.load %arg8[%c0_36, %c0_37] : memref<32x1xf32, #tpu.memory_space<vmem>>, vector<32x1xf32>
    %67 = vector.broadcast %66 : vector<32x1xf32> to vector<32x128xf32>
    %68 = arith.addf %65, %67 : vector<32x128xf32>
    %69 = vector.broadcast %4 : vector<1x128xf32> to vector<32x128xf32>
    %70 = arith.mulf %68, %69 : vector<32x128xf32>
    %cst_38 = arith.constant 0.000000e+00 : f32
    %71 = vector.broadcast %cst_38 : f32 to vector<32x128xf32>
    %72 = arith.maximumf %70, %71 : vector<32x128xf32>
    %73 = arith.truncf %72 : vector<32x128xf32> to vector<32x128xbf16>
    %c1_39 = arith.constant 1 : index
    %c0_40 = arith.constant 0 : index
    %c0_41 = arith.constant 0 : index
    %74 = vector.load %arg9[%c1_39, %c0_40, %c0_41] : memref<3x34x32xbf16, #tpu.memory_space<vmem>>, vector<1x34x32xbf16>
    %75 = vector.shape_cast %74 : vector<1x34x32xbf16> to vector<34x32xbf16>
    %cst_42 = arith.constant dense<0.000000e+00> : vector<34x128xf32>
    %76 = tpu.matmul %75, %73, %cst_42 {dimension_numbers = #tpu.dot_dimension_numbers<[1], [0], [0], [1], [0, 0, 1, 1], [], []>} : vector<34x32xbf16>, vector<32x128xbf16>, vector<34x128xf32> -> vector<34x128xf32>
    %c0_43 = arith.constant 0 : index
    %c0_44 = arith.constant 0 : index
    %c0_45 = arith.constant 0 : index
    %77 = vector.load %arg9[%c0_43, %c0_44, %c0_45] : memref<3x34x32xbf16, #tpu.memory_space<vmem>>, vector<1x34x32xbf16>
    %78 = vector.shape_cast %77 : vector<1x34x32xbf16> to vector<34x32xbf16>
    %cst_46 = arith.constant dense<0.000000e+00> : vector<34x128xf32>
    %79 = tpu.matmul %78, %73, %cst_46 {dimension_numbers = #tpu.dot_dimension_numbers<[1], [0], [0], [1], [0, 0, 1, 1], [], []>} : vector<34x32xbf16>, vector<32x128xbf16>, vector<34x128xf32> -> vector<34x128xf32>
    %c1_i32_47 = arith.constant 1 : i32
    %80 = tpu.dynamic_rotate %79 by %c1_i32_47 dim 1 : vector<34x128xf32>, i32 -> vector<34x128xf32>
    %cst_48 = arith.constant 0.000000e+00 : f32
    %81 = vector.shape_cast %8 : vector<1x128xi1> to vector<1x128xi1>
    %82 = vector.broadcast %81 : vector<1x128xi1> to vector<34x128xi1>
    %83 = vector.broadcast %cst_48 : f32 to vector<34x128xf32>
    %84 = arith.select %82, %80, %83 : vector<34x128xi1>, vector<34x128xf32>
    %85 = arith.addf %76, %84 : vector<34x128xf32>
    %c2_49 = arith.constant 2 : index
    %c0_50 = arith.constant 0 : index
    %c0_51 = arith.constant 0 : index
    %86 = vector.load %arg9[%c2_49, %c0_50, %c0_51] : memref<3x34x32xbf16, #tpu.memory_space<vmem>>, vector<1x34x32xbf16>
    %87 = vector.shape_cast %86 : vector<1x34x32xbf16> to vector<34x32xbf16>
    %cst_52 = arith.constant dense<0.000000e+00> : vector<34x128xf32>
    %88 = tpu.matmul %87, %73, %cst_52 {dimension_numbers = #tpu.dot_dimension_numbers<[1], [0], [0], [1], [0, 0, 1, 1], [], []>} : vector<34x32xbf16>, vector<32x128xbf16>, vector<34x128xf32> -> vector<34x128xf32>
    %c127_i32_53 = arith.constant 127 : i32
    %89 = tpu.dynamic_rotate %88 by %c127_i32_53 dim 1 : vector<34x128xf32>, i32 -> vector<34x128xf32>
    %cst_54 = arith.constant 0.000000e+00 : f32
    %90 = vector.shape_cast %10 : vector<1x128xi1> to vector<1x128xi1>
    %91 = vector.broadcast %90 : vector<1x128xi1> to vector<34x128xi1>
    %92 = vector.broadcast %cst_54 : f32 to vector<34x128xf32>
    %93 = arith.select %91, %89, %92 : vector<34x128xi1>, vector<34x128xf32>
    %94 = arith.addf %85, %93 : vector<34x128xf32>
    %c0_55 = arith.constant 0 : index
    %c0_56 = arith.constant 0 : index
    %95 = vector.load %arg10[%c0_55, %c0_56] : memref<34x1xf32, #tpu.memory_space<vmem>>, vector<34x1xf32>
    %96 = vector.broadcast %95 : vector<34x1xf32> to vector<34x128xf32>
    %97 = arith.addf %94, %96 : vector<34x128xf32>
    %98 = vector.broadcast %5 : vector<1x128xf32> to vector<34x128xf32>
    %99 = arith.mulf %97, %98 : vector<34x128xf32>
    %cst_57 = arith.constant 0.000000e+00 : f32
    %100 = vector.broadcast %cst_57 : f32 to vector<34x128xf32>
    %101 = arith.maximumf %99, %100 : vector<34x128xf32>
    %c0_58 = arith.constant 0 : index
    %c0_59 = arith.constant 0 : index
    %c0_60 = arith.constant 0 : index
    %102 = vector.load %arg11[%c0_58, %c0_59, %c0_60] : memref<1x34x128xf32, #tpu.memory_space<vmem>>, vector<1x34x128xf32>
    %103 = vector.shape_cast %102 : vector<1x34x128xf32> to vector<34x128xf32>
    %104 = vector.shape_cast %101 : vector<34x128xf32> to vector<1x34x128xf32>
    tpu.vector_store %arg11[%c0_58, %c0_59, %c0_60], %104 {strides = array<i32>} : memref<1x34x128xf32, #tpu.memory_space<vmem>>, vector<1x34x128xf32>,
    %c0_61 = arith.constant 0 : index
    %c0_62 = arith.constant 0 : index
    %c0_63 = arith.constant 0 : index
    %105 = vector.load %arg2[%c0_61, %c0_62, %c0_63] : memref<1x32x128xf32, #tpu.memory_space<vmem>>, vector<1x32x128xf32>
    %106 = vector.shape_cast %105 : vector<1x32x128xf32> to vector<32x128xf32>
    %c0_64 = arith.constant 0 : index
    %c0_65 = arith.constant 0 : index
    %c0_66 = arith.constant 0 : index
    %107 = vector.load %arg4[%c0_64, %c0_65, %c0_66] : memref<1x2x128xf32, #tpu.memory_space<vmem>>, vector<1x2x128xf32>
    %108 = vector.shape_cast %107 : vector<1x2x128xf32> to vector<2x128xf32>
    %109 = vector.extract_strided_slice %108 {offsets = [0, 0], sizes = [1, 128], strides = [1, 1]} : vector<2x128xf32> to vector<1x128xf32>
    %110 = vector.extract_strided_slice %108 {offsets = [1, 0], sizes = [1, 128], strides = [1, 1]} : vector<2x128xf32> to vector<1x128xf32>
    %111 = tpu.iota {dimensions = array<i32: 1>} : vector<1x128xi32>
    %c0_i32_67 = arith.constant 0 : i32
    %112 = vector.broadcast %c0_i32_67 : i32 to vector<1x128xi32>
    %113 = arith.cmpi ne, %111, %112 : vector<1x128xi32>
    %c127_i32_68 = arith.constant 127 : i32
    %114 = vector.broadcast %c127_i32_68 : i32 to vector<1x128xi32>
    %115 = arith.cmpi ne, %111, %114 : vector<1x128xi32>
    %116 = arith.truncf %106 : vector<32x128xf32> to vector<32x128xbf16>
    %c1_69 = arith.constant 1 : index
    %c0_70 = arith.constant 0 : index
    %c0_71 = arith.constant 0 : index
    %117 = vector.load %arg5[%c1_69, %c0_70, %c0_71] : memref<3x32x32xbf16, #tpu.memory_space<vmem>>, vector<1x32x32xbf16>
    %118 = vector.shape_cast %117 : vector<1x32x32xbf16> to vector<32x32xbf16>
    %cst_72 = arith.constant dense<0.000000e+00> : vector<32x128xf32>
    %119 = tpu.matmul %118, %116, %cst_72 {dimension_numbers = #tpu.dot_dimension_numbers<[1], [0], [0], [1], [0, 0, 1, 1], [], []>} : vector<32x32xbf16>, vector<32x128xbf16>, vector<32x128xf32> -> vector<32x128xf32>
    %c1_i32_73 = arith.constant 1 : i32
    %120 = tpu.dynamic_rotate %106 by %c1_i32_73 dim 1 : vector<32x128xf32>, i32 -> vector<32x128xf32>
    %cst_74 = arith.constant 0.000000e+00 : f32
    %121 = vector.shape_cast %113 : vector<1x128xi1> to vector<1x128xi1>
    %122 = vector.broadcast %121 : vector<1x128xi1> to vector<32x128xi1>
    %123 = vector.broadcast %cst_74 : f32 to vector<32x128xf32>
    %124 = arith.select %122, %120, %123 : vector<32x128xi1>, vector<32x128xf32>
    %125 = arith.truncf %124 : vector<32x128xf32> to vector<32x128xbf16>
    %c0_75 = arith.constant 0 : index
    %c0_76 = arith.constant 0 : index
    %c0_77 = arith.constant 0 : index
    %126 = vector.load %arg5[%c0_75, %c0_76, %c0_77] : memref<3x32x32xbf16, #tpu.memory_space<vmem>>, vector<1x32x32xbf16>
    %127 = vector.shape_cast %126 : vector<1x32x32xbf16> to vector<32x32xbf16>
    %cst_78 = arith.constant dense<0.000000e+00> : vector<32x128xf32>
    %128 = tpu.matmul %127, %125, %cst_78 {dimension_numbers = #tpu.dot_dimension_numbers<[1], [0], [0], [1], [0, 0, 1, 1], [], []>} : vector<32x32xbf16>, vector<32x128xbf16>, vector<32x128xf32> -> vector<32x128xf32>
    %129 = arith.addf %119, %128 : vector<32x128xf32>
    %c127_i32_79 = arith.constant 127 : i32
    %130 = tpu.dynamic_rotate %106 by %c127_i32_79 dim 1 : vector<32x128xf32>, i32 -> vector<32x128xf32>
    %cst_80 = arith.constant 0.000000e+00 : f32
    %131 = vector.shape_cast %115 : vector<1x128xi1> to vector<1x128xi1>
    %132 = vector.broadcast %131 : vector<1x128xi1> to vector<32x128xi1>
    %133 = vector.broadcast %cst_80 : f32 to vector<32x128xf32>
    %134 = arith.select %132, %130, %133 : vector<32x128xi1>, vector<32x128xf32>
    %135 = arith.truncf %134 : vector<32x128xf32> to vector<32x128xbf16>
    %c2_81 = arith.constant 2 : index
    %c0_82 = arith.constant 0 : index
    %c0_83 = arith.constant 0 : index
    %136 = vector.load %arg5[%c2_81, %c0_82, %c0_83] : memref<3x32x32xbf16, #tpu.memory_space<vmem>>, vector<1x32x32xbf16>
    %137 = vector.shape_cast %136 : vector<1x32x32xbf16> to vector<32x32xbf16>
    %cst_84 = arith.constant dense<0.000000e+00> : vector<32x128xf32>
    %138 = tpu.matmul %137, %135, %cst_84 {dimension_numbers = #tpu.dot_dimension_numbers<[1], [0], [0], [1], [0, 0, 1, 1], [], []>} : vector<32x32xbf16>, vector<32x128xbf16>, vector<32x128xf32> -> vector<32x128xf32>
    %139 = arith.addf %129, %138 : vector<32x128xf32>
    %c0_85 = arith.constant 0 : index
    %c0_86 = arith.constant 0 : index
    %140 = vector.load %arg6[%c0_85, %c0_86] : memref<32x1xf32, #tpu.memory_space<vmem>>, vector<32x1xf32>
    %141 = vector.broadcast %140 : vector<32x1xf32> to vector<32x128xf32>
    %142 = arith.addf %139, %141 : vector<32x128xf32>
    %143 = vector.broadcast %109 : vector<1x128xf32> to vector<32x128xf32>
    %144 = arith.mulf %142, %143 : vector<32x128xf32>
    %cst_87 = arith.constant 0.000000e+00 : f32
    %145 = vector.broadcast %cst_87 : f32 to vector<32x128xf32>
    %146 = arith.maximumf %144, %145 : vector<32x128xf32>
    %147 = arith.truncf %146 : vector<32x128xf32> to vector<32x128xbf16>
    %c1_88 = arith.constant 1 : index
    %c0_89 = arith.constant 0 : index
    %c0_90 = arith.constant 0 : index
    %148 = vector.load %arg7[%c1_88, %c0_89, %c0_90] : memref<3x32x32xbf16, #tpu.memory_space<vmem>>, vector<1x32x32xbf16>
    %149 = vector.shape_cast %148 : vector<1x32x32xbf16> to vector<32x32xbf16>
    %cst_91 = arith.constant dense<0.000000e+00> : vector<32x128xf32>
    %150 = tpu.matmul %149, %147, %cst_91 {dimension_numbers = #tpu.dot_dimension_numbers<[1], [0], [0], [1], [0, 0, 1, 1], [], []>} : vector<32x32xbf16>, vector<32x128xbf16>, vector<32x128xf32> -> vector<32x128xf32>
    %c1_i32_92 = arith.constant 1 : i32
    %151 = tpu.dynamic_rotate %146 by %c1_i32_92 dim 1 : vector<32x128xf32>, i32 -> vector<32x128xf32>
    %cst_93 = arith.constant 0.000000e+00 : f32
    %152 = vector.shape_cast %113 : vector<1x128xi1> to vector<1x128xi1>
    %153 = vector.broadcast %152 : vector<1x128xi1> to vector<32x128xi1>
    %154 = vector.broadcast %cst_93 : f32 to vector<32x128xf32>
    %155 = arith.select %153, %151, %154 : vector<32x128xi1>, vector<32x128xf32>
    %156 = arith.truncf %155 : vector<32x128xf32> to vector<32x128xbf16>
    %c0_94 = arith.constant 0 : index
    %c0_95 = arith.constant 0 : index
    %c0_96 = arith.constant 0 : index
    %157 = vector.load %arg7[%c0_94, %c0_95, %c0_96] : memref<3x32x32xbf16, #tpu.memory_space<vmem>>, vector<1x32x32xbf16>
    %158 = vector.shape_cast %157 : vector<1x32x32xbf16> to vector<32x32xbf16>
    %cst_97 = arith.constant dense<0.000000e+00> : vector<32x128xf32>
    %159 = tpu.matmul %158, %156, %cst_97 {dimension_numbers = #tpu.dot_dimension_numbers<[1], [0], [0], [1], [0, 0, 1, 1], [], []>} : vector<32x32xbf16>, vector<32x128xbf16>, vector<32x128xf32> -> vector<32x128xf32>
    %160 = arith.addf %150, %159 : vector<32x128xf32>
    %c127_i32_98 = arith.constant 127 : i32
    %161 = tpu.dynamic_rotate %146 by %c127_i32_98 dim 1 : vector<32x128xf32>, i32 -> vector<32x128xf32>
    %cst_99 = arith.constant 0.000000e+00 : f32
    %162 = vector.shape_cast %115 : vector<1x128xi1> to vector<1x128xi1>
    %163 = vector.broadcast %162 : vector<1x128xi1> to vector<32x128xi1>
    %164 = vector.broadcast %cst_99 : f32 to vector<32x128xf32>
    %165 = arith.select %163, %161, %164 : vector<32x128xi1>, vector<32x128xf32>
    %166 = arith.truncf %165 : vector<32x128xf32> to vector<32x128xbf16>
    %c2_100 = arith.constant 2 : index
    %c0_101 = arith.constant 0 : index
    %c0_102 = arith.constant 0 : index
    %167 = vector.load %arg7[%c2_100, %c0_101, %c0_102] : memref<3x32x32xbf16, #tpu.memory_space<vmem>>, vector<1x32x32xbf16>
    %168 = vector.shape_cast %167 : vector<1x32x32xbf16> to vector<32x32xbf16>
    %cst_103 = arith.constant dense<0.000000e+00> : vector<32x128xf32>
    %169 = tpu.matmul %168, %166, %cst_103 {dimension_numbers = #tpu.dot_dimension_numbers<[1], [0], [0], [1], [0, 0, 1, 1], [], []>} : vector<32x32xbf16>, vector<32x128xbf16>, vector<32x128xf32> -> vector<32x128xf32>
    %170 = arith.addf %160, %169 : vector<32x128xf32>
    %c0_104 = arith.constant 0 : index
    %c0_105 = arith.constant 0 : index
    %171 = vector.load %arg8[%c0_104, %c0_105] : memref<32x1xf32, #tpu.memory_space<vmem>>, vector<32x1xf32>
    %172 = vector.broadcast %171 : vector<32x1xf32> to vector<32x128xf32>
    %173 = arith.addf %170, %172 : vector<32x128xf32>
    %174 = vector.broadcast %109 : vector<1x128xf32> to vector<32x128xf32>
    %175 = arith.mulf %173, %174 : vector<32x128xf32>
    %cst_106 = arith.constant 0.000000e+00 : f32
    %176 = vector.broadcast %cst_106 : f32 to vector<32x128xf32>
    %177 = arith.maximumf %175, %176 : vector<32x128xf32>
    %178 = arith.truncf %177 : vector<32x128xf32> to vector<32x128xbf16>
    %c1_107 = arith.constant 1 : index
    %c0_108 = arith.constant 0 : index
    %c0_109 = arith.constant 0 : index
    %179 = vector.load %arg9[%c1_107, %c0_108, %c0_109] : memref<3x34x32xbf16, #tpu.memory_space<vmem>>, vector<1x34x32xbf16>
    %180 = vector.shape_cast %179 : vector<1x34x32xbf16> to vector<34x32xbf16>
    %cst_110 = arith.constant dense<0.000000e+00> : vector<34x128xf32>
    %181 = tpu.matmul %180, %178, %cst_110 {dimension_numbers = #tpu.dot_dimension_numbers<[1], [0], [0], [1], [0, 0, 1, 1], [], []>} : vector<34x32xbf16>, vector<32x128xbf16>, vector<34x128xf32> -> vector<34x128xf32>
    %c0_111 = arith.constant 0 : index
    %c0_112 = arith.constant 0 : index
    %c0_113 = arith.constant 0 : index
    %182 = vector.load %arg9[%c0_111, %c0_112, %c0_113] : memref<3x34x32xbf16, #tpu.memory_space<vmem>>, vector<1x34x32xbf16>
    %183 = vector.shape_cast %182 : vector<1x34x32xbf16> to vector<34x32xbf16>
    %cst_114 = arith.constant dense<0.000000e+00> : vector<34x128xf32>
    %184 = tpu.matmul %183, %178, %cst_114 {dimension_numbers = #tpu.dot_dimension_numbers<[1], [0], [0], [1], [0, 0, 1, 1], [], []>} : vector<34x32xbf16>, vector<32x128xbf16>, vector<34x128xf32> -> vector<34x128xf32>
    %c1_i32_115 = arith.constant 1 : i32
    %185 = tpu.dynamic_rotate %184 by %c1_i32_115 dim 1 : vector<34x128xf32>, i32 -> vector<34x128xf32>
    %cst_116 = arith.constant 0.000000e+00 : f32
    %186 = vector.shape_cast %113 : vector<1x128xi1> to vector<1x128xi1>
    %187 = vector.broadcast %186 : vector<1x128xi1> to vector<34x128xi1>
    %188 = vector.broadcast %cst_116 : f32 to vector<34x128xf32>
    %189 = arith.select %187, %185, %188 : vector<34x128xi1>, vector<34x128xf32>
    %190 = arith.addf %181, %189 : vector<34x128xf32>
    %c2_117 = arith.constant 2 : index
    %c0_118 = arith.constant 0 : index
    %c0_119 = arith.constant 0 : index
    %191 = vector.load %arg9[%c2_117, %c0_118, %c0_119] : memref<3x34x32xbf16, #tpu.memory_space<vmem>>, vector<1x34x32xbf16>
    %192 = vector.shape_cast %191 : vector<1x34x32xbf16> to vector<34x32xbf16>
    %cst_120 = arith.constant dense<0.000000e+00> : vector<34x128xf32>
    %193 = tpu.matmul %192, %178, %cst_120 {dimension_numbers = #tpu.dot_dimension_numbers<[1], [0], [0], [1], [0, 0, 1, 1], [], []>} : vector<34x32xbf16>, vector<32x128xbf16>, vector<34x128xf32> -> vector<34x128xf32>
    %c127_i32_121 = arith.constant 127 : i32
    %194 = tpu.dynamic_rotate %193 by %c127_i32_121 dim 1 : vector<34x128xf32>, i32 -> vector<34x128xf32>
    %cst_122 = arith.constant 0.000000e+00 : f32
    %195 = vector.shape_cast %115 : vector<1x128xi1> to vector<1x128xi1>
    %196 = vector.broadcast %195 : vector<1x128xi1> to vector<34x128xi1>
    %197 = vector.broadcast %cst_122 : f32 to vector<34x128xf32>
    %198 = arith.select %196, %194, %197 : vector<34x128xi1>, vector<34x128xf32>
    %199 = arith.addf %190, %198 : vector<34x128xf32>
    %c0_123 = arith.constant 0 : index
    %c0_124 = arith.constant 0 : index
    %200 = vector.load %arg10[%c0_123, %c0_124] : memref<34x1xf32, #tpu.memory_space<vmem>>, vector<34x1xf32>
    %201 = vector.broadcast %200 : vector<34x1xf32> to vector<34x128xf32>
    %202 = arith.addf %199, %201 : vector<34x128xf32>
    %203 = vector.broadcast %110 : vector<1x128xf32> to vector<34x128xf32>
    %204 = arith.mulf %202, %203 : vector<34x128xf32>
    %cst_125 = arith.constant 0.000000e+00 : f32
    %205 = vector.broadcast %cst_125 : f32 to vector<34x128xf32>
    %206 = arith.maximumf %204, %205 : vector<34x128xf32>
    %c0_126 = arith.constant 0 : index
    %c0_127 = arith.constant 0 : index
    %c0_128 = arith.constant 0 : index
    %207 = vector.load %arg12[%c0_126, %c0_127, %c0_128] : memref<1x34x128xf32, #tpu.memory_space<vmem>>, vector<1x34x128xf32>
    %208 = vector.shape_cast %207 : vector<1x34x128xf32> to vector<34x128xf32>
    %209 = vector.shape_cast %206 : vector<34x128xf32> to vector<1x34x128xf32>
    tpu.vector_store %arg12[%c0_126, %c0_127, %c0_128], %209 {strides = array<i32>} : memref<1x34x128xf32, #tpu.memory_space<vmem>>, vector<1x34x128xf32>,
    return
  }
  func.func @transform_0(%arg0: i32) -> (i32, i32, i32) {
    %c0_i32 = arith.constant 0 : i32
    %c0_i32_0 = arith.constant 0 : i32
    %c0_i32_1 = arith.constant 0 : i32
    return %arg0, %c0_i32, %c0_i32_0 : i32, i32, i32
  }
  func.func @transform_1(%arg0: i32) -> (i32, i32, i32) {
    %c0_i32 = arith.constant 0 : i32
    %c0_i32_0 = arith.constant 0 : i32
    %c0_i32_1 = arith.constant 0 : i32
    return %arg0, %c0_i32, %c0_i32_0 : i32, i32, i32
  }
  func.func @transform_2(%arg0: i32) -> (i32, i32, i32) {
    %c0_i32 = arith.constant 0 : i32
    %c0_i32_0 = arith.constant 0 : i32
    %c0_i32_1 = arith.constant 0 : i32
    return %arg0, %c0_i32, %c0_i32_0 : i32, i32, i32
  }
  func.func @transform_3(%arg0: i32) -> (i32, i32, i32) {
    %c0_i32 = arith.constant 0 : i32
    %c0_i32_0 = arith.constant 0 : i32
    %c0_i32_1 = arith.constant 0 : i32
    return %arg0, %c0_i32, %c0_i32_0 : i32, i32, i32
  }
  func.func @transform_4(%arg0: i32) -> (i32, i32, i32) {
    %c0_i32 = arith.constant 0 : i32
    %c0_i32_0 = arith.constant 0 : i32
    %c0_i32_1 = arith.constant 0 : i32
    %c0_i32_2 = arith.constant 0 : i32
    return %c0_i32, %c0_i32_0, %c0_i32_1 : i32, i32, i32
  }
  func.func @transform_5(%arg0: i32) -> (i32, i32) {
    %c0_i32 = arith.constant 0 : i32
    %c0_i32_0 = arith.constant 0 : i32
    %c0_i32_1 = arith.constant 0 : i32
    return %c0_i32, %c0_i32_0 : i32, i32
  }
  func.func @transform_6(%arg0: i32) -> (i32, i32, i32) {
    %c0_i32 = arith.constant 0 : i32
    %c0_i32_0 = arith.constant 0 : i32
    %c0_i32_1 = arith.constant 0 : i32
    %c0_i32_2 = arith.constant 0 : i32
    return %c0_i32, %c0_i32_0, %c0_i32_1 : i32, i32, i32
  }
  func.func @transform_7(%arg0: i32) -> (i32, i32) {
    %c0_i32 = arith.constant 0 : i32
    %c0_i32_0 = arith.constant 0 : i32
    %c0_i32_1 = arith.constant 0 : i32
    return %c0_i32, %c0_i32_0 : i32, i32
  }
  func.func @transform_8(%arg0: i32) -> (i32, i32, i32) {
    %c0_i32 = arith.constant 0 : i32
    %c0_i32_0 = arith.constant 0 : i32
    %c0_i32_1 = arith.constant 0 : i32
    %c0_i32_2 = arith.constant 0 : i32
    return %c0_i32, %c0_i32_0, %c0_i32_1 : i32, i32, i32
  }
  func.func @transform_9(%arg0: i32) -> (i32, i32) {
    %c0_i32 = arith.constant 0 : i32
    %c0_i32_0 = arith.constant 0 : i32
    %c0_i32_1 = arith.constant 0 : i32
    return %c0_i32, %c0_i32_0 : i32, i32
  }
  func.func @transform_10(%arg0: i32) -> (i32, i32, i32) {
    %c0_i32 = arith.constant 0 : i32
    %c0_i32_0 = arith.constant 0 : i32
    %c0_i32_1 = arith.constant 0 : i32
    return %arg0, %c0_i32, %c0_i32_0 : i32, i32, i32
  }
  func.func @transform_11(%arg0: i32) -> (i32, i32, i32) {
    %c0_i32 = arith.constant 0 : i32
    %c0_i32_0 = arith.constant 0 : i32
    %c0_i32_1 = arith.constant 0 : i32
    return %arg0, %c0_i32, %c0_i32_0 : i32, i32, i32
  }
}

</mosaic_0001>

<bundles_post_ra>
// kernel: tpu_custom_call.1
= control target key start
LH: loop header
LB: loop body
LE: loop exit
PB: predicated region body
PF: predicated region fallthrough
CT: control target
= control target key end

     0   :  { %17 = vsyncpa [#allocation3], 0  ;;  %s2930_s0 = inlined_call_operand.vmem [shape: f32[2,32,128], index: 0, kind: input, shape index: {}]   ;;  %s2931_s1 = inlined_call_operand.vmem [shape: f32[2,32,128], index: 1, kind: input, shape index: {}]   ;;  %s2932_s2 = inlined_call_operand.vmem [shape: f32[2,2,128], index: 2, kind: input, shape index: {}]   ;;  %s2933_s3 = inlined_call_operand.vmem [shape: f32[2,2,128], index: 3, kind: input, shape index: {}]   ;;  %s2934_s4 = inlined_call_operand.hbm [shape: bf16[3,32,32], index: 4, kind: input, shape index: {}]   ;;  %s2935_s5 = inlined_call_operand.vmem [shape: f32[32,1], index: 5, kind: input, shape index: {}]   ;;  %s2936_s6 = inlined_call_operand.hbm [shape: bf16[3,32,32], index: 6, kind: input, shape index: {}]   ;;  %s2937_s7 = inlined_call_operand.vmem [shape: f32[32,1], index: 7, kind: input, shape index: {}]   ;;  %s2938_s8 = inlined_call_operand.vmem [shape: bf16[3,34,32], index: 8, kind: input, shape index: {}]   ;;  %s2939_s9 = inlined_call_operand.vmem [shape: f32[34,1], index: 9, kind: input, shape index: {}]   ;;  %s2940_s10 = inlined_call_operand.vmem [shape: f32[2,34,128], index: 10, kind: output, shape index: {0}]   ;;  %s2941_s11 = inlined_call_operand.vmem [shape: f32[2,34,128], index: 11, kind: output, shape index: {1}]  }
   0x1   :  { %18 = vsyncpa [#allocation5], 0  ;;  %s2458_s17 = smov 0  }
   0x2 LB: > { %s322_s20 = sshll.u32 %s2934_s4, 4  ;;  %s1886_s21 = sadd.s32 4294967295, %s2389_s17   ;;  %s2389_s17 = sphi %s2458_s17, %s24_s17   ;;  %s323_s20 = int_to_ptr.hbm [resolvable:$true] %s322_s20 }
   0x3   : > { %p1888_p0 = scmp.ge.s32.totalorder %s2389_s17, 1  ;;  %p311_p1 = scmp.lt.s32.totalorder %s2389_s17, 3 }
   0x4   : > { %p2213_p2 = scmp.eq.s32.totalorder %s1886_s21, 0  ;;  %s2391_s23 = smov [#allocation2]  }
   0x5   : > { %p2469_p3 = pnand %p1888_p0, %p311_p1  ;;  %s324_s24 = sshll.u32 %s2391_s23, 4  ;;  %s325_s24 = int_to_ptr.vmem [resolvable:$true] %s324_s24 }
   0x6   : > { %s339_s27 = sshll.u32 %s2936_s6, 4  ;;  %s2392_s28 = smov [#allocation4]   ;;  %s340_s27 = int_to_ptr.hbm [resolvable:$true] %s339_s27 }
   0x7   : > { %p2206_p4 = pneg %p2469_p3  ;;  %s341_s29 = sshll.u32 %s2392_s28, 4  ;;  %s342_s29 = int_to_ptr.vmem [resolvable:$true] %s341_s29 }
   0x8   : > { %s2393_s30 = smov 64   ;;  %s2394_s12 = smov 4  }
   0x9   : > { %p2207_p5 = pnand %p2213_p2, %p2206_p4  ;;  %396 = sbr.rel (%p2469_p3) target bundleno = 1445 (0x5a5), region = 60 }
   0xb   : > { %2209 = dma.hbm_to_vmem [thread:$0]  (!%p2207_p5), %s323_s20, 768, %s325_s24, [#allocation3], %s2393_s30, %s2393_s30, %s2394_s12  }
   0xc   : > { %2212 = dma.hbm_to_vmem [thread:$0]  (!%p2207_p5), %s340_s27, 768, %s342_s29, [#allocation5], %s2393_s30, %s2393_s30, %s2394_s12  }
   0xe   : > { %2380 = dma.done.wait (%p2213_p2), [#allocation3], 768  }
   0xf   : > { %2382 = vsyncadd (%p2213_p2), [#allocation3], 4294966528 }
  0x10   : > { %2384 = dma.done.wait (%p2213_p2), [#allocation5], 768  }
  0x11   : > { %2386 = vsyncadd (%p2213_p2), [#allocation5], 4294966528  ;;  %p460_p6 = scmp.lt.s32.totalorder %s1886_s21, 1  ;;  %s2395_s18 = smov 1   ;;  %v2161_v8 = vld [vmem:[#allocation2 + $0x10] sm:$0xff]  ;;  %vm535_vm0 = vcmask 261120   ;;  %v494_v9 = vlaneseq }
  0x12   : > { %s2396_s19 = smov 127   ;;  %v2162_v16 = vld [vmem:[#allocation2 + $0x18] sm:$0xff]  ;;  %v2163_v29 = vld [vmem:[#allocation2] sm:$0xff]  ;;  %v2164_v31 = vld [vmem:[#allocation2 + $0x8] sm:$0xff]  ;;  %v2397_v34 = vmov 0  }
  0x13   : > { %s2948_s21 = smov (!%p460_p6, %s1886_s21), 1  ;;  %v2498_v10 = vand.u32 127, %v494_v9  ;;  %v2530_v32 = vld [vmem:[%s2935_s5] sm:$0xff]  ;;  %v2535_v33 = vld [vmem:[%s2935_s5 + $0x8] sm:$0xff]  ;;  %2253 = vset.pattern.permute.xlu0 %v2397_v34  ;;  %2254 = vset.pattern.permute.xlu1 %v2397_v34  ;;  %v2540_v35 = vld [vmem:[%s2935_s5 + $0x10] sm:$0xff] }
  0x14   : > { %s2159_s13 = sshll.u32 %s2948_s21, 5  ;;  %2252 = vset.pattern.permute.xlu2 %v2397_v34  ;;  %v2548_v36 = vld [vmem:[%s2935_s5 + $0x18] sm:$0xff]  ;;  %v2165_v37 = vld [vmem:[#allocation2 + $0x20] sm:$0xff]  ;;  %v2166_v38 = vld [vmem:[#allocation2 + $0x28] sm:$0xff]  ;;  %s1899_s29 = sshll.u32 %s2948_s21, 1 }
  0x15   : > { %s464_s16 = scalar_lea.vmem %s2930_s0, %s2159_s13  ;;  %vm496_vm1 = vcmp.ne.s32.totalorder %v2498_v10, 0  ;;  %vm497_vm3 = vcmp.ne.s32.totalorder %v2498_v10, 127  ;;  %672 = vperm.xlu2 %2252, %v2540_v35   ;;  %s473_s14 = scalar_lea.vmem %s2932_s2, %s1899_s29 }
  0x16   : > { %v491_v0 = vld [vmem:[%s464_s16 + $0x10] sm:$0xff]  ;;  %v492_v1 = vld [vmem:[%s464_s16 + $0x18] sm:$0xff]  ;;  %v489_v3 = vld [vmem:[%s464_s16] sm:$0xff]  ;;  %s469_s25 = scalar_lea.vmem %s2931_s1, %s2159_s13  ;;  %s477_s22 = scalar_lea.vmem %s2933_s3, %s1899_s29 }
  0x17   : > { %v2232_v2 = vpack.i.bf16 %v492_v1, %v491_v0  ;;  %v490_v4 = vld [vmem:[%s464_s16 + $0x8] sm:$0xff]  ;;  %v499_v6 = vpack.c.bf16 %v492_v1, %v491_v0  ;;  %vm2504_vm2 = vmpackc.low %vm496_vm1, %vm496_vm1  ;;  %v2559_v48 = vld [vmem:[%s473_s14] sm:$0x3]  ;;  %s2197_s14 = smul.u32 40, %s2948_s21 }
  0x18   : > { %v2237_v5 = vpack.i.bf16 %v490_v4, %v489_v3  ;;  %v498_v7 = vpack.c.bf16 %v490_v4, %v489_v3  ;;  %vm2515_vm4 = vmpackc.low %vm497_vm3, %vm497_vm3  ;;  %v2562_v50 = vperm.slane %v2559_v48, 0 }
  0x19   : > { %2233 = vrot.lane.b32.xlu0 %v2232_v2, %s2395_s18  ;;  %2243 = vrot.lane.b32.xlu1 %v2232_v2, %s2396_s19  ;;  %s2808_s20 = scalar_lea.vmem %s2940_s10, %s2197_s14  ;;  %s2904_s26 = scalar_lea.vmem %s2941_s11, %s2197_s14 }
  0x1a   : > { %583 = vmatpush.bf16.msra.mxu1 %v499_v6 }
  0x1d   : > { %677 = vperm.xlu2 %2252, %v2548_v36  }
  0x1e   : > { %584 = vmatpush.bf16.msra.mxu1 %v498_v7  ;;  %v2571_v7 = vld [vmem:[%s2937_s7] sm:$0xff] }
  0x21   : > { %2238 = vrot.lane.b32.xlu0 %v2237_v5, %s2395_s18  ;;  %2248 = vrot.lane.b32.xlu1 %v2237_v5, %s2396_s19 }
  0x22   : > { %1927 = vmatmul.msk.bf16.vlgmr.msra.gmra.mxu1 %vm535_vm0, %v2161_v8  ;;  %v2576_v8 = vld [vmem:[%s2937_s7 + $0x10] sm:$0xff] }
  0x29   : > { %662 = vperm.xlu0 %2253, %v2530_v32   ;;  %667 = vperm.xlu1 %2254, %v2535_v33  }
  0x32   : > { %1928 = vmatmul.msk.bf16.gmra.mxu1 %vm535_vm0, %v2162_v16  ;;  %v2587_v16 = vld [vmem:[%s469_s25 + $0x10] sm:$0xff] }
  0x6f   : > { %v673_v62 = vpop.permute.xlu2 %672 }
  0x8b   : > { %v2234_v11 = vpop.permute.xlu0 %2233  ;;  %v2244_v12 = vpop.permute.xlu1 %2243 }
  0x8c   : > { %v2236_v13 = vunpack.i.h.bf16 %v2234_v11  ;;  %v2235_v14 = vunpack.i.l.bf16 %v2234_v11  ;;  %v2246_v18 = vunpack.i.h.bf16 %v2244_v12  ;;  %v2245_v19 = vunpack.i.l.bf16 %v2244_v12  ;;  %v678_v11 = vpop.permute.xlu2 %677 }
  0x8e   : > { %v1912_v17 = vpack.c.bf16 %v2236_v13, %v2235_v14  ;;  %v1938_v24 = vpack.c.bf16 %v2246_v18, %v2245_v19 }
  0x90   : > { %1913 = vmatpush.bf16.msk.msra.mxu2 %vm2504_vm2, %v1912_v17  ;;  %v2589_v17 = vld [vmem:[%s469_s25 + $0x18] sm:$0xff] }
  0x93   : > { %v2239_v20 = vpop.permute.xlu0 %2238  ;;  %v2249_v21 = vpop.permute.xlu1 %2248 }
  0x94   : > { %v2241_v22 = vunpack.i.h.bf16 %v2239_v20  ;;  %v2240_v23 = vunpack.i.l.bf16 %v2239_v20  ;;  %v2251_v25 = vunpack.i.h.bf16 %v2249_v21  ;;  %v2250_v26 = vunpack.i.l.bf16 %v2249_v21 }
  0x95   : > { %v2280_v20 = vpack.i.bf16 %v2589_v17, %v2587_v16 }
  0x96   : > { %v1915_v27 = vpack.c.bf16 %v2241_v22, %v2240_v23  ;;  %v1941_v30 = vpack.c.bf16 %v2251_v25, %v2250_v26  ;;  %v2596_v23 = vld [vmem:[%s2937_s7 + $0x8] sm:$0xff]  ;;  %v2601_v25 = vld [vmem:[%s469_s25] sm:$0xff] }
  0x97   : > { %v2603_v26 = vld [vmem:[%s469_s25 + $0x8] sm:$0xff] }
  0x98   : > { %1916 = vmatpush.bf16.msk.msra.mxu2 %vm2504_vm2, %v1915_v27  ;;  %v2285_v27 = vpack.i.bf16 %v2603_v26, %v2601_v25 }
  0x9b   : > { %1917 = vmatmul.msk.bf16.vlgmr.msra.gmra.mxu2 %vm535_vm0, %v2163_v29  ;;  %v663_v49 = vpop.permute.xlu0 %662  ;;  %v668_v54 = vpop.permute.xlu1 %667  ;;  %v2613_v29 = vld [vmem:[%s2937_s7 + $0x18] sm:$0xff] }
  0x9c   : > { %1939 = vmatpush.bf16.msk.msrb.mxu2 %vm2515_vm4, %v1938_v24 }
  0x9f   : > { %v586_v42 = vpop.f32.mrf.mxu1 }
  0xa0   : > { %1942 = vmatpush.bf16.msk.msrb.mxu2 %vm2515_vm4, %v1941_v30  ;;  %v2167_v30 = vld [vmem:[#allocation4 + $0x10] sm:$0xff] }
  0xa7   : > { %v588_v44 = vpop.f32.mrf.mxu1 }
  0xab   : > { %1918 = vmatmul.msk.bf16.gmra.mxu2 %vm535_vm0, %v2164_v31  ;;  %v2168_v31 = vld [vmem:[#allocation4 + $0x18] sm:$0xff] }
  0xaf   : > { %v591_v56 = vpop.f32.mrf.mxu1 }
  0xb7   : > { %v593_v3 = vpop.f32.mrf.mxu1 }
  0xbb   : > { %1943 = vmatmul.msk.bf16.vlgmr.msrb.gmra.mxu2 %vm535_vm0, %v2165_v37 }
  0xcb   : > { %1944 = vmatmul.msk.bf16.gmra.mxu2 %vm535_vm0, %v2166_v38 }
 0x11e   : > { %v551_v39 = vpop.f32.mrf.mxu2 }
 0x11f   : > { %v587_v46 = vadd.f32 %v586_v42, %v551_v39 }
 0x126   : > { %v553_v40 = vpop.f32.mrf.mxu2 }
 0x127   : > { %v589_v51 = vadd.f32 %v588_v44, %v553_v40 }
 0x12e   : > { %v556_v41 = vpop.f32.mrf.mxu2 }
 0x12f   : > { %v592_v0 = vadd.f32 %v591_v56, %v556_v41 }
 0x136   : > { %v558_v43 = vpop.f32.mrf.mxu2 }
 0x137   : > { %v594_v4 = vadd.f32 %v593_v3, %v558_v43 }
 0x13e   : > { %v642_v45 = vpop.f32.mrf.mxu2 }
 0x13f   : > { %v652_v47 = vadd.f32 %v642_v45, %v587_v46 }
 0x141   : > { %v680_v52 = vadd.f32 %v663_v49, %v652_v47  ;;  %v2169_v47 = vld [vmem:[#allocation4] sm:$0xff] }
 0x143   : > { %v685_v57 = vmul.f32 %v2562_v50, %v680_v52 }
 0x145   : > { %v689_v60 = vmax.f32 %v685_v57, 0.0 }
 0x146   : > { %v644_v53 = vpop.f32.mrf.mxu2 }
 0x147   : > { %v653_v55 = vadd.f32 %v644_v53, %v589_v51  ;;  %v2171_v53 = vld [vmem:[#allocation4 + $0x20] sm:$0xff] }
 0x149   : > { %v681_v58 = vadd.f32 %v668_v54, %v653_v55 }
 0x14b   : > { %v686_v59 = vmul.f32 %v2562_v50, %v681_v58 }
 0x14d   : > { %v690_v61 = vmax.f32 %v686_v59, 0.0  ;;  %v2170_v59 = vld [vmem:[#allocation4 + $0x8] sm:$0xff] }
 0x14e   : > { %v647_v63 = vpop.f32.mrf.mxu2 }
 0x14f   : > { %v2270_v1 = vpack.i.bf16 %v690_v61, %v689_v60  ;;  %v654_v2 = vadd.f32 %v647_v63, %v592_v0  ;;  %v693_v24 = vpack.c.bf16 %v690_v61, %v689_v60  ;;  %v2172_v61 = vld [vmem:[#allocation4 + $0x28] sm:$0xff] }
 0x151   : > { %2271 = vrot.lane.b32.xlu0 %v2270_v1, %s2396_s19  ;;  %2256 = vrot.lane.b32.xlu1 %v2270_v1, %s2395_s18  ;;  %v682_v5 = vadd.f32 %v673_v62, %v654_v2 }
 0x153   : > { %v687_v12 = vmul.f32 %v2562_v50, %v682_v5 }
 0x155   : > { %v691_v18 = vmax.f32 %v687_v12, 0.0 }
 0x156   : > { %v649_v6 = vpop.f32.mrf.mxu2 }
 0x157   : > { %v655_v9 = vadd.f32 %v649_v6, %v594_v4 }
 0x159   : > { %v683_v13 = vadd.f32 %v678_v11, %v655_v9  ;;  %852 = vperm.xlu0 %2253, %v2571_v7   ;;  %862 = vperm.xlu1 %2254, %v2576_v8  }
 0x15b   : > { %v688_v14 = vmul.f32 %v2562_v50, %v683_v13 }
 0x15d   : > { %v692_v19 = vmax.f32 %v688_v14, 0.0 }
 0x15f   : > { %v2260_v21 = vpack.i.bf16 %v692_v19, %v691_v18  ;;  %v694_v22 = vpack.c.bf16 %v692_v19, %v691_v18 }
 0x161   : > { %2261 = vrot.lane.b32.xlu2 %v2260_v21, %s2395_s18  ;;  %775 = vmatpush.bf16.msra.mxu0 %v694_v22 }
 0x162   : > { %2281 = vrot.lane.b32.xlu0 %v2280_v20, %s2395_s18  ;;  %857 = vperm.xlu1 %2254, %v2596_v23  }
 0x165   : > { %776 = vmatpush.bf16.msra.mxu0 %v693_v24 }
 0x168   : > { %1969 = vmatmul.msk.bf16.vlgmr.msra.gmra.mxu0 %vm535_vm0, %v2167_v30 }
 0x169   : > { %2266 = vrot.lane.b32.xlu2 %v2260_v21, %s2396_s19 }
 0x16a   : > { %1294 = vperm.xlu0 %2253, %v2540_v35   ;;  %2286 = vrot.lane.b32.xlu1 %v2285_v27, %s2396_s19 }
 0x171   : > { %867 = vperm.xlu2 %2252, %v2613_v29  }
 0x172   : > { %1289 = vperm.xlu0 %2253, %v2535_v33   ;;  %1299 = vperm.xlu1 %2254, %v2548_v36  }
 0x178   : > { %1970 = vmatmul.msk.bf16.gmra.mxu0 %vm535_vm0, %v2168_v31 }
 0x179   : > { %2276 = vrot.lane.b32.xlu2 %v2280_v20, %s2396_s19 }
 0x181   : > { %2291 = vrot.lane.b32.xlu2 %v2285_v27, %s2395_s18 }
 0x189   : > { %1284 = vperm.xlu2 %2252, %v2530_v32  }
 0x1bb   : > { %v2262_v34 = vpop.permute.xlu2 %2261 }
 0x1bc   : > { %v2264_v35 = vunpack.i.h.bf16 %v2262_v34  ;;  %v2263_v37 = vunpack.i.l.bf16 %v2262_v34 }
 0x1be   : > { %v1954_v38 = vpack.c.bf16 %v2264_v35, %v2263_v37 }
 0x1c0   : > { %1955 = vmatpush.bf16.msk.msra.mxu3 %vm2504_vm2, %v1954_v38 }
 0x1c3   : > { %v2267_v33 = vpop.permute.xlu2 %2266  ;;  %v2272_v36 = vpop.permute.xlu0 %2271 }
 0x1c4   : > { %v2269_v39 = vunpack.i.h.bf16 %v2267_v33  ;;  %v2268_v40 = vunpack.i.l.bf16 %v2267_v33  ;;  %v2257_v41 = vpop.permute.xlu1 %2256  ;;  %v2274_v44 = vunpack.i.h.bf16 %v2272_v36  ;;  %v2273_v45 = vunpack.i.l.bf16 %v2272_v36 }
 0x1c5   : > { %v2259_v42 = vunpack.i.h.bf16 %v2257_v41  ;;  %v2258_v32 = vunpack.i.l.bf16 %v2257_v41 }
 0x1c6   : > { %v1980_v43 = vpack.c.bf16 %v2269_v39, %v2268_v40  ;;  %v1983_v49 = vpack.c.bf16 %v2274_v44, %v2273_v45 }
 0x1c7   : > { %v1957_v46 = vpack.c.bf16 %v2259_v42, %v2258_v32 }
 0x1c8   : > { %1981 = vmatpush.bf16.msk.msrb.mxu1 %vm2515_vm4, %v1980_v43 }
 0x1c9   : > { %1958 = vmatpush.bf16.msk.msra.mxu3 %vm2504_vm2, %v1957_v46 }
 0x1cb   : > { %v868_v51 = vpop.permute.xlu2 %867  ;;  %v853_v52 = vpop.permute.xlu0 %852 }
 0x1cc   : > { %1959 = vmatmul.msk.bf16.vlgmr.msra.gmra.mxu3 %vm535_vm0, %v2169_v47  ;;  %1984 = vmatpush.bf16.msk.msrb.mxu1 %vm2515_vm4, %v1983_v49  ;;  %v863_v11 = vpop.permute.xlu1 %862 }
 0x1cf   : > { %1985 = vmatmul.msk.bf16.vlgmr.msrb.gmra.mxu1 %vm535_vm0, %v2171_v53 }
 0x1d3   : > { %v2277_v54 = vpop.permute.xlu2 %2276 }
 0x1d4   : > { %v2282_v55 = vpop.permute.xlu0 %2281  ;;  %v858_v34 = vpop.permute.xlu1 %857  ;;  %v2279_v44 = vunpack.i.h.bf16 %v2277_v54  ;;  %v2278_v45 = vunpack.i.l.bf16 %v2277_v54  ;;  %v2173_v54 = vld [vmem:[%s2938_s8 + $0x14] sm:$0xff] }
 0x1d5   : > { %v2284_v56 = vunpack.i.h.bf16 %v2282_v55  ;;  %v2283_v57 = vunpack.i.l.bf16 %v2282_v55 }
 0x1d7   : > { %v2039_v58 = vpack.c.bf16 %v2284_v56, %v2283_v57 }
 0x1d9   : > { %2040 = vmatpush.bf16.msk.msra.mxu1 %vm2504_vm2, %v2039_v58 }
 0x1db   : > { %v2292_v60 = vpop.permute.xlu2 %2291 }
 0x1dc   : > { %v2294_v62 = vunpack.i.h.bf16 %v2292_v60  ;;  %v2293_v63 = vunpack.i.l.bf16 %v2292_v60  ;;  %1960 = vmatmul.msk.bf16.gmra.mxu3 %vm535_vm0, %v2170_v59  ;;  %v2287_v53 = vpop.permute.xlu1 %2286  ;;  %v2176_v59 = vld [vmem:[%s2938_s8 + $0x8] sm:$0xff]  ;;  %v2174_v60 = vld [vmem:[%s2938_s8 + $0x1c] sm:$0xff] }
 0x1dd   : > { %v2289_v55 = vunpack.i.h.bf16 %v2287_v53  ;;  %v2288_v56 = vunpack.i.l.bf16 %v2287_v53 }
 0x1de   : > { %v2042_v0 = vpack.c.bf16 %v2294_v62, %v2293_v63 }
 0x1df   : > { %1986 = vmatmul.msk.bf16.gmra.mxu1 %vm535_vm0, %v2172_v61  ;;  %v2068_v58 = vpack.c.bf16 %v2289_v55, %v2288_v56  ;;  %v1991_v61 = vld [vmem:[%s2938_s8 + $0x24] sm:$0x1] }
 0x1e0   : > { %2043 = vmatpush.bf16.msk.msra.mxu1 %vm2504_vm2, %v2042_v0  ;;  %v964_v63 = vunpack.c.l.b16 %v1991_v61 }
 0x1e5   : > { %v778_v1 = vpop.f32.mrf.mxu0 }
 0x1ed   : > { %v780_v4 = vpop.f32.mrf.mxu0 }
 0x1f5   : > { %v783_v9 = vpop.f32.mrf.mxu0 }
 0x1fd   : > { %v785_v22 = vpop.f32.mrf.mxu0 }
 0x24c   : > { %v832_v2 = vpop.f32.mrf.mxu1 }
 0x24f   : > { %v743_v3 = vpop.f32.mrf.mxu3 }
 0x250   : > { %v779_v19 = vadd.f32 %v778_v1, %v743_v3  ;;  %v967_v1 = vpack.c.b16 %v964_v63, %v964_v63  ;;  %v2179_v3 = vld [vmem:[#allocation2 + $0x10] sm:$0xff] }
 0x252   : > { %v842_v27 = vadd.f32 %v832_v2, %v779_v19  ;;  %v2177_v2 = vld [vmem:[%s2938_s8 + $0x28] sm:$0xff] }
 0x254   : > { %v834_v5 = vpop.f32.mrf.mxu1  ;;  %v870_v33 = vadd.f32 %v853_v52, %v842_v27  ;;  %v2065_v52 = vpack.c.bf16 %v2279_v44, %v2278_v45  ;;  %v1285_v44 = vpop.permute.xlu2 %1284 }
 0x256   : > { %v874_v43 = vmul.f32 %v870_v33, %v2562_v50 }
 0x257   : > { %v745_v6 = vpop.f32.mrf.mxu3 }
 0x258   : > { %v781_v18 = vadd.f32 %v780_v4, %v745_v6  ;;  %v878_v49 = vmax.f32 %v874_v43, 0.0  ;;  %v2183_v4 = vld [vmem:[#allocation2 + $0x20] sm:$0xff]  ;;  %v2018_v6 = vld [vmem:[%s2938_s8 + $0x38] sm:$0x1] }
 0x259   : > { %v2720_v43 = vld [vmem:[%s477_s22] sm:$0x3] }
 0x25a   : > { %v843_v21 = vadd.f32 %v834_v5, %v781_v18  ;;  %v2178_v5 = vld [vmem:[%s2938_s8 + $0x30] sm:$0xff] }
 0x25c   : > { %v837_v12 = vpop.f32.mrf.mxu1  ;;  %v871_v37 = vadd.f32 %v858_v34, %v843_v21 }
 0x25e   : > { %v875_v41 = vmul.f32 %v871_v37, %v2562_v50 }
 0x25f   : > { %v748_v13 = vpop.f32.mrf.mxu3 }
 0x260   : > { %v784_v14 = vadd.f32 %v783_v9, %v748_v13  ;;  %v879_v47 = vmax.f32 %v875_v41, 0.0  ;;  %v1015_v9 = vunpack.c.l.b16 %v2018_v6 }
 0x262   : > { %v844_v20 = vadd.f32 %v837_v12, %v784_v14  ;;  %v882_v57 = vpack.c.bf16 %v879_v47, %v878_v49  ;;  %v2184_v12 = vld [vmem:[#allocation2 + $0x28] sm:$0xff]  ;;  %v1018_v13 = vpack.c.b16 %v1015_v9, %v1015_v9  ;;  %v2723_v47 = vperm.slane %v2720_v43, 0 }
 0x264   : > { %v872_v30 = vadd.f32 %v863_v11, %v844_v20  ;;  %v839_v35 = vpop.f32.mrf.mxu1  ;;  %v2180_v11 = vld [vmem:[#allocation2 + $0x18] sm:$0xff] }
 0x266   : > { %v876_v36 = vmul.f32 %v872_v30, %v2562_v50 }
 0x267   : > { %v750_v24 = vpop.f32.mrf.mxu3 }
 0x268   : > { %v786_v31 = vadd.f32 %v785_v22, %v750_v24  ;;  %v880_v42 = vmax.f32 %v876_v36, 0.0 }
 0x26a   : > { %v845_v38 = vadd.f32 %v839_v35, %v786_v31 }
 0x26c   : > { %v873_v39 = vadd.f32 %v868_v51, %v845_v38  ;;  %v1128_v51 = vpack.c.bf16 %v2589_v17, %v2587_v16  ;;  %v1127_v16 = vpack.c.bf16 %v2603_v26, %v2601_v25  ;;  %v2181_v17 = vld [vmem:[#allocation2] sm:$0xff]  ;;  %v2182_v25 = vld [vmem:[#allocation2 + $0x8] sm:$0xff]  ;;  %v894_v26 = vld [vmem:[%s2938_s8 + $0x10] sm:$0x1] }
 0x26d   : > { %2044 = vmatmul.msk.bf16.vlgmr.msra.gmra.mxu1 %vm535_vm0, %v2181_v17  ;;  %v904_v62 = vunpack.c.l.b16 %v894_v26 }
 0x26e   : > { %v877_v40 = vmul.f32 %v873_v39, %v2562_v50  ;;  %v2175_v50 = vld [vmem:[%s2938_s8] sm:$0xff] }
 0x26f   : > { %v907_v0 = vpack.c.b16 %v904_v62, %v904_v62 }
 0x270   : > { %v881_v32 = vmax.f32 %v877_v40, 0.0  ;;  %v1295_v40 = vpop.permute.xlu0 %1294 }
 0x272   : > { %v883_v46 = vpack.c.bf16 %v881_v32, %v880_v42 }
 0x274   : > { %923 = vmatpush.bf16.msra.mxu2 %v883_v46  ;;  %983 = vmatpush.bf16.msrb.mxu3 %v883_v46 }
 0x275   : > { %1034 = vmatpush.bf16.msrb.mxu0 %v883_v46 }
 0x278   : > { %924 = vmatpush.bf16.msra.mxu2 %v882_v57  ;;  %984 = vmatpush.bf16.msrb.mxu3 %v882_v57 }
 0x279   : > { %1035 = vmatpush.bf16.msrb.mxu0 %v882_v57 }
 0x27b   : > { %2000 = vmatmul.msk.bf16.vlgmr.msra.gmra.mxu2 %vm535_vm0, %v2175_v50  ;;  %2011 = vmatmul.msk.bf16.vlgmr.msrb.gmra.mxu3 %vm535_vm0, %v2173_v54 }
 0x27c   : > { %1208 = vmatpush.bf16.msrb.mxu2 %v1128_v51  ;;  %2066 = vmatpush.bf16.msk.msra.mxu3 %vm2515_vm4, %v2065_v52  ;;  %v1290_v52 = vpop.permute.xlu0 %1289 }
 0x27d   : > { %2045 = vmatmul.msk.bf16.gmra.mxu1 %vm535_vm0, %v2182_v25  ;;  %2027 = vmatmul.msk.bf16.vlgmr.msrb.gmra.mxu0 %vm535_vm0, %v2177_v2 }
 0x280   : > { %1209 = vmatpush.bf16.msrb.mxu2 %v1127_v16  ;;  %2069 = vmatpush.bf16.msk.msra.mxu3 %vm2515_vm4, %v2068_v58 }
 0x28b   : > { %2001 = vmatmul.msk.bf16.gmra.mxu2 %vm535_vm0, %v2176_v59  ;;  %2012 = vmatmul.msk.bf16.gmra.mxu3 %vm535_vm0, %v2174_v60 }
 0x28d   : > { %2028 = vmatmul.msk.bf16.gmra.mxu0 %vm535_vm0, %v2178_v5 }
 0x29b   : > { %2002 = vmatmul.msk.bf16.gmra.mxu2 %vm535_vm0, %v907_v0  ;;  %2013 = vmatmul.msk.bf16.gmra.mxu3 %vm535_vm0, %v967_v1 }
 0x29d   : > { %2029 = vmatmul.msk.bf16.gmra.mxu0 %vm535_vm0, %v1018_v13 }
 0x2ab   : > { %2054 = vmatmul.msk.bf16.vlgmr.msrb.gmra.mxu2 %vm535_vm0, %v2179_v3  ;;  %2070 = vmatmul.msk.bf16.vlgmr.msra.gmra.mxu3 %vm535_vm0, %v2183_v4  ;;  %v1300_v4 = vpop.permute.xlu1 %1299 }
 0x2bb   : > { %2055 = vmatmul.msk.bf16.gmra.mxu2 %vm535_vm0, %v2180_v11  ;;  %2071 = vmatmul.msk.bf16.gmra.mxu3 %vm535_vm0, %v2184_v12 }
 0x2ea   : > { %v1176_v37 = vpop.f32.mrf.mxu1 }
 0x2f2   : > { %v1178_v41 = vpop.f32.mrf.mxu1 }
 0x2fa   : > { %v2713_v38 = vpop.f32.mrf.mxu0  ;;  %v1181_v50 = vpop.f32.mrf.mxu1 }
 0x2fe   : > { %v2693_v14 = vpop.f32.mrf.mxu2  ;;  %v2695_v18 = vpop.f32.mrf.mxu3 }
 0x302   : > { %v1039_v32 = vpop.f32.mrf.mxu0  ;;  %v1183_v62 = vpop.f32.mrf.mxu1 }
 0x306   : > { %v2697_v19 = vpop.f32.mrf.mxu2  ;;  %v2699_v20 = vpop.f32.mrf.mxu3 }
 0x30a   : > { %v1042_v57 = vpop.f32.mrf.mxu0 }
 0x30e   : > { %v2701_v21 = vpop.f32.mrf.mxu2  ;;  %v2703_v22 = vpop.f32.mrf.mxu3 }
 0x312   : > { %v1044_v61 = vpop.f32.mrf.mxu0 }
 0x316   : > { %v2705_v24 = vpop.f32.mrf.mxu2  ;;  %v2707_v27 = vpop.f32.mrf.mxu3 }
 0x31a   : > { %v1047_v9 = vpop.f32.mrf.mxu0 }
 0x31e   : > { %v2709_v30 = vpop.f32.mrf.mxu2  ;;  %v2711_v31 = vpop.f32.mrf.mxu3 }
 0x326   : > { %v938_v34 = vpop.f32.mrf.mxu2  ;;  %v998_v35 = vpop.f32.mrf.mxu3 }
 0x32e   : > { %v1211_v33 = vpop.f32.mrf.mxu2  ;;  %v1264_v36 = vpop.f32.mrf.mxu3 }
 0x32f   : > { %v1212_v39 = vadd.f32 %v1211_v33, %v1176_v37  ;;  %v1049_v37 = vpop.f32.mrf.mxu0 }
 0x331   : > { %v1274_v42 = vadd.f32 %v1264_v36, %v1212_v39 }
 0x333   : > { %v1302_v49 = vadd.f32 %v1285_v44, %v1274_v42 }
 0x335   : > { %v1307_v55 = vmul.f32 %v2723_v47, %v1302_v49 }
 0x336   : > { %v1213_v45 = vpop.f32.mrf.mxu2  ;;  %v1266_v46 = vpop.f32.mrf.mxu3 }
 0x337   : > { %v1214_v53 = vadd.f32 %v1213_v45, %v1178_v41  ;;  %v1311_v17 = vmax.f32 %v1307_v55, 0.0 }
 0x339   : > { %v1275_v51 = vadd.f32 %v1266_v46, %v1214_v53 }
 0x33b   : > { %v1303_v56 = vadd.f32 %v1290_v52, %v1275_v51 }
 0x33d   : > { %v1308_v54 = vmul.f32 %v2723_v47, %v1303_v56 }
 0x33e   : > { %v1216_v58 = vpop.f32.mrf.mxu2  ;;  %v1269_v16 = vpop.f32.mrf.mxu3 }
 0x33f   : > { %v1312_v59 = vmax.f32 %v1308_v54, 0.0  ;;  %v1217_v60 = vadd.f32 %v1216_v58, %v1181_v50  ;;  %v2189_v50 = vld [vmem:[#allocation4 + $0x20] sm:$0xff] }
 0x341   : > { %v2305_v25 = vpack.i.bf16 %v1312_v59, %v1311_v17  ;;  %v1276_v26 = vadd.f32 %v1269_v16, %v1217_v60  ;;  %v1315_v33 = vpack.c.bf16 %v1312_v59, %v1311_v17  ;;  %v2187_v59 = vld [vmem:[#allocation4] sm:$0xff] }
 0x343   : > { %2306 = vrot.lane.b32.xlu0 %v2305_v25, %s2396_s19  ;;  %v1304_v0 = vadd.f32 %v1295_v40, %v1276_v26  ;;  %v2186_v40 = vld [vmem:[#allocation4 + $0x18] sm:$0xff] }
 0x345   : > { %v1309_v5 = vmul.f32 %v2723_v47, %v1304_v0 }
 0x346   : > { %v1218_v63 = vpop.f32.mrf.mxu2  ;;  %v1271_v2 = vpop.f32.mrf.mxu3 }
 0x347   : > { %v1219_v1 = vadd.f32 %v1218_v63, %v1183_v62  ;;  %v1313_v12 = vmax.f32 %v1309_v5, 0.0  ;;  %v2190_v62 = vld [vmem:[#allocation4 + $0x28] sm:$0xff] }
 0x349   : > { %v1277_v3 = vadd.f32 %v1271_v2, %v1219_v1  ;;  %v1106_v1 = vperm.slane %v2559_v48, 1 }
 0x34b   : > { %v1305_v6 = vadd.f32 %v1300_v4, %v1277_v3  ;;  %1487 = vperm.xlu0 %2253, %v2613_v29   ;;  %v1075_v29 = vld [vmem:[%s2939_s9 + $0x20] sm:$0x3]  ;;  %v2188_v3 = vld [vmem:[#allocation4 + $0x8] sm:$0xff] }
 0x34d   : > { %v1310_v11 = vmul.f32 %v2723_v47, %v1305_v6 }
 0x34f   : > { %v1314_v13 = vmax.f32 %v1310_v11, 0.0 }
 0x351   : > { %v2300_v34 = vpack.i.bf16 %v1314_v13, %v1313_v12  ;;  %v1316_v35 = vpack.c.bf16 %v1314_v13, %v1313_v12 }
 0x353   : > { %2301 = vrot.lane.b32.xlu2 %v2300_v34, %s2395_s18  ;;  %2296 = vrot.lane.b32.xlu1 %v2300_v34, %s2396_s19 }
 0x354   : > { %1396 = vmatpush.bf16.msra.mxu0 %v1316_v35  ;;  %940 = vrot.lane.b32.xlu0 %v2693_v14, %s2395_s18  ;;  %v2771_v14 = vld [vmem:[%s2939_s9 + $0x18] sm:$0xff] }
 0x358   : > { %1397 = vmatpush.bf16.msra.mxu0 %v1315_v33 }
 0x35b   : > { %1482 = vperm.xlu2 %2252, %v2576_v8   ;;  %2311 = vrot.lane.b32.xlu1 %v2305_v25, %s2395_s18  ;;  %v2750_v8 = vld [vmem:[%s2939_s9 + $0x10] sm:$0xff] }
 0x35c   : > { %946 = vrot.lane.b32.xlu0 %v2705_v24, %s2395_s18 }
 0x363   : > { %1477 = vperm.xlu2 %2252, %v2596_v23   ;;  %1472 = vperm.xlu1 %2254, %v2571_v7   ;;  %v1072_v7 = vld [vmem:[%s2939_s9 + $0x8] sm:$0xff]  ;;  %v1071_v23 = vld [vmem:[%s2939_s9] sm:$0xff] }
 0x364   : > { %1053 = vrot.lane.b32.xlu0 %v1039_v32, %s2396_s19 }
 0x36b   : > { %944 = vrot.lane.b32.xlu2 %v2701_v21, %s2395_s18  ;;  %942 = vrot.lane.b32.xlu1 %v2697_v19, %s2395_s18  ;;  %v2185_v19 = vld [vmem:[#allocation4 + $0x10] sm:$0xff] }
 0x36c   : > { %1059 = vrot.lane.b32.xlu0 %v1047_v9, %s2396_s19  ;;  %2096 = vmatmul.msk.bf16.vlgmr.msra.gmra.mxu0 %vm535_vm0, %v2185_v19 }
 0x373   : > { %1051 = vrot.lane.b32.xlu2 %v2713_v38, %s2396_s19  ;;  %948 = vrot.lane.b32.xlu1 %v2709_v30, %s2395_s18 }
 0x374   : > { %1088 = vperm.xlu0 %2253, %v2750_v8  }
 0x37b   : > { %1057 = vrot.lane.b32.xlu2 %v1044_v61, %s2396_s19  ;;  %1055 = vrot.lane.b32.xlu1 %v1042_v57, %s2396_s19 }
 0x37c   : > { %2097 = vmatmul.msk.bf16.gmra.mxu0 %vm535_vm0, %v2186_v40 }
 0x383   : > { %1083 = vperm.xlu2 %2252, %v1072_v7   ;;  %1078 = vperm.xlu1 %2254, %v1071_v23  }
 0x38b   : > { %1098 = vperm.xlu2 %2252, %v1075_v29   ;;  %1093 = vperm.xlu1 %2254, %v2771_v14  }
 0x393   : > { %1701 = vperm.xlu2 %2252, %v1072_v7   ;;  %1696 = vperm.xlu1 %2254, %v1071_v23  }
 0x3ad   : > { %v2302_v21 = vpop.permute.xlu2 %2301 }
 0x3ae   : > { %v2304_v24 = vunpack.i.h.bf16 %v2302_v21  ;;  %v2303_v30 = vunpack.i.l.bf16 %v2302_v21 }
 0x3b0   : > { %v2081_v38 = vpack.c.bf16 %v2304_v24, %v2303_v30 }
 0x3b2   : > { %2082 = vmatpush.bf16.msk.msrb.mxu1 %vm2504_vm2, %v2081_v38 }
 0x3b5   : > { %v2777_v36 = vpop.permute.xlu2 %1482  ;;  %v2307_v39 = vpop.permute.xlu0 %2306 }
 0x3b6   : > { %v2309_v53 = vunpack.i.h.bf16 %v2307_v39  ;;  %v2308_v51 = vunpack.i.l.bf16 %v2307_v39 }
 0x3b8   : > { %v2110_v55 = vpack.c.bf16 %v2309_v53, %v2308_v51 }
 0x3bd   : > { %v2779_v41 = vpop.permute.xlu2 %1477  ;;  %v2781_v42 = vpop.permute.xlu0 %1487 }
 0x3c5   : > { %v945_v32 = vpop.permute.xlu2 %944  ;;  %v2297_v44 = vpop.permute.xlu1 %2296 }
 0x3c6   : > { %v2299_v45 = vunpack.i.h.bf16 %v2297_v44  ;;  %v2298_v46 = vunpack.i.l.bf16 %v2297_v44  ;;  %v941_v49 = vpop.permute.xlu0 %940  ;;  %v952_v34 = vsel %vm496_vm1, %v945_v32, 0.0 }
 0x3c7   : > { %v992_v33 = vadd.f32 %v2703_v22, %v952_v34  ;;  %v950_v19 = vsel %vm496_vm1, %v941_v49, 0.0 }
 0x3c8   : > { %v2107_v52 = vpack.c.bf16 %v2299_v45, %v2298_v46  ;;  %v987_v22 = vadd.f32 %v2695_v18, %v950_v19  ;;  %v2196_v19 = vld [vmem:[%s2938_s8 + $0x30] sm:$0xff] }
 0x3ca   : > { %2108 = vmatpush.bf16.msk.msra.mxu2 %vm2515_vm4, %v2107_v52 }
 0x3cd   : > { %v1052_v56 = vpop.permute.xlu2 %1051  ;;  %v2312_v57 = vpop.permute.xlu1 %2311 }
 0x3ce   : > { %v2314_v54 = vunpack.i.h.bf16 %v2312_v57  ;;  %v2313_v58 = vunpack.i.l.bf16 %v2312_v57  ;;  %2111 = vmatpush.bf16.msk.msra.mxu2 %vm2515_vm4, %v2110_v55  ;;  %v947_v17 = vpop.permute.xlu0 %946  ;;  %v1061_v30 = vsel %vm497_vm3, %v1052_v56, 0.0 }
 0x3cf   : > { %v1066_v40 = vadd.f32 %v1061_v30, %v987_v22  ;;  %v953_v46 = vsel %vm496_vm1, %v947_v17, 0.0 }
 0x3d0   : > { %v2084_v16 = vpack.c.bf16 %v2314_v54, %v2313_v58  ;;  %v994_v51 = vadd.f32 %v2707_v27, %v953_v46 }
 0x3d1   : > { %2112 = vmatmul.msk.bf16.vlgmr.msra.gmra.mxu2 %vm535_vm0, %v2189_v50 }
 0x3d2   : > { %2085 = vmatpush.bf16.msk.msrb.mxu1 %vm2504_vm2, %v2084_v16 }
 0x3d5   : > { %v2791_v60 = vpop.permute.xlu1 %1472  ;;  %2086 = vmatmul.msk.bf16.vlgmr.msrb.gmra.mxu1 %vm535_vm0, %v2187_v59  ;;  %v1058_v25 = vpop.permute.xlu2 %1057 }
 0x3d6   : > { %v1054_v26 = vpop.permute.xlu0 %1053  ;;  %v1064_v53 = vsel %vm497_vm3, %v1058_v25, 0.0 }
 0x3d7   : > { %v1062_v28 = vsel %vm497_vm3, %v1054_v26, 0.0  ;;  %v1069_v55 = vadd.f32 %v1064_v53, %v994_v51 }
 0x3dd   : > { %v943_v61 = vpop.permute.xlu1 %942  ;;  %v1084_v15 = vpop.permute.xlu2 %1083 }
 0x3de   : > { %v951_v63 = vsel %vm496_vm1, %v943_v61, 0.0  ;;  %v1060_v6 = vpop.permute.xlu0 %1059 }
 0x3df   : > { %v989_v0 = vadd.f32 %v2699_v20, %v951_v63  ;;  %v1065_v48 = vsel %vm497_vm3, %v1060_v6, 0.0 }
 0x3e1   : > { %v1067_v2 = vadd.f32 %v1062_v28, %v989_v0  ;;  %2113 = vmatmul.msk.bf16.gmra.mxu2 %vm535_vm0, %v2190_v62 }
 0x3e3   : > { %v1102_v4 = vadd.f32 %v1084_v15, %v1067_v2 }
 0x3e5   : > { %v1108_v5 = vmul.f32 %v1106_v1, %v1102_v4  ;;  %v949_v9 = vpop.permute.xlu1 %948  ;;  %2087 = vmatmul.msk.bf16.gmra.mxu1 %vm535_vm0, %v2188_v3  ;;  %v1099_v35 = vpop.permute.xlu2 %1098 }
 0x3e6   : > { %v954_v20 = vsel %vm496_vm1, %v949_v9, 0.0  ;;  %v1089_v24 = vpop.permute.xlu0 %1088 }
 0x3e7   : > { %v1113_v11 = vmax.f32 %v1108_v5, 0.0  ;;  %v997_v12 = vadd.f32 %v2711_v31, %v954_v20 }
 0x3e9   : > { %1118 = vst [vmem:[%s2808_s20 + $0x8] sm:$0xff] %v1113_v11  ;;  %v1070_v13 = vadd.f32 %v1065_v48, %v997_v12  ;;  %v1399_v54 = vpop.f32.mrf.mxu0 }
 0x3eb   : > { %v1105_v37 = vadd.f32 %v1099_v35, %v1070_v13 }
 0x3ed   : > { %v1111_v7 = vmul.f32 %v1106_v1, %v1105_v37  ;;  %v1056_v23 = vpop.permute.xlu1 %1055 }
 0x3ee   : > { %v1063_v29 = vsel %vm497_vm3, %v1056_v23, 0.0 }
 0x3ef   : > { %v1116_v21 = vmax.f32 %v1111_v7, 0.0  ;;  %v1068_v31 = vadd.f32 %v1063_v29, %v992_v33  ;;  %v2194_v29 = vld [vmem:[%s2938_s8 + $0x8] sm:$0xff] }
 0x3f1   : > { %1121 = vst [vmem:[%s2808_s20 + $0x20] sm:$0x3] %v1116_v21  ;;  %v1103_v38 = vadd.f32 %v1089_v24, %v1068_v31  ;;  %v1401_v59 = vpop.f32.mrf.mxu0  ;;  %v1513_v21 = vld [vmem:[%s2938_s8 + $0x10] sm:$0x1]  ;;  %v2145_v31 = vld [vmem:[%s2938_s8 + $0x38] sm:$0x1] }
 0x3f2   : > { %v1523_v24 = vunpack.c.l.b16 %v1513_v21  ;;  %v1633_v30 = vunpack.c.l.b16 %v2145_v31 }
 0x3f3   : > { %v1109_v39 = vmul.f32 %v1106_v1, %v1103_v38 }
 0x3f4   : > { %v1526_v38 = vpack.c.b16 %v1523_v24, %v1523_v24  ;;  %v1636_v22 = vpack.c.b16 %v1633_v30, %v1633_v30 }
 0x3f5   : > { %v1114_v32 = vmax.f32 %v1109_v39, 0.0  ;;  %v1079_v44 = vpop.permute.xlu1 %1078  ;;  %v2192_v39 = vld [vmem:[%s2938_s8 + $0x1c] sm:$0xff] }
 0x3f6   : > { %v1101_v45 = vadd.f32 %v1079_v44, %v1066_v40  ;;  %v2118_v40 = vld [vmem:[%s2938_s8 + $0x24] sm:$0x1] }
 0x3f7   : > { %1119 = vst [vmem:[%s2808_s20 + $0x10] sm:$0xff] %v1114_v32  ;;  %v1583_v32 = vunpack.c.l.b16 %v2118_v40 }
 0x3f8   : > { %v1107_v49 = vmul.f32 %v1106_v1, %v1101_v45 }
 0x3f9   : > { %v1404_v61 = vpop.f32.mrf.mxu0  ;;  %v1586_v44 = vpack.c.b16 %v1583_v32, %v1583_v32 }
 0x3fa   : > { %v1112_v52 = vmax.f32 %v1107_v49, 0.0 }
 0x3fc   : > { %1117 = vst [vmem:[%s2808_s20] sm:$0xff] %v1112_v52 }
 0x3fd   : > { %v1094_v18 = vpop.permute.xlu1 %1093 }
 0x3fe   : > { %v1104_v56 = vadd.f32 %v1094_v18, %v1069_v55 }
 0x400   : > { %v1110_v57 = vmul.f32 %v1106_v1, %v1104_v56 }
 0x401   : > { %v1406_v2 = vpop.f32.mrf.mxu0 }
 0x402   : > { %v1115_v50 = vmax.f32 %v1110_v57, 0.0  ;;  %v1693_v57 = vld [vmem:[%s2939_s9 + $0x20] sm:$0x3] }
 0x404   : > { %1120 = vst [vmem:[%s2808_s20 + $0x18] sm:$0xff] %v1115_v50 }
 0x452   : > { %v1364_v58 = vpop.f32.mrf.mxu1 }
 0x453   : > { %v1400_v27 = vadd.f32 %v1399_v54, %v1364_v58 }
 0x454   : > { %v1452_v16 = vpop.f32.mrf.mxu2 }
 0x455   : > { %v1462_v4 = vadd.f32 %v1452_v16, %v1400_v27 }
 0x457   : > { %v1490_v20 = vadd.f32 %v2791_v60, %v1462_v4  ;;  %v2193_v60 = vld [vmem:[%s2938_s8] sm:$0xff] }
 0x459   : > { %v1494_v35 = vmul.f32 %v1490_v20, %v2723_v47 }
 0x45a   : > { %v1366_v17 = vpop.f32.mrf.mxu1 }
 0x45b   : > { %v1402_v63 = vadd.f32 %v1401_v59, %v1366_v17  ;;  %v1498_v23 = vmax.f32 %v1494_v35, 0.0 }
 0x45c   : > { %v1454_v26 = vpop.f32.mrf.mxu2 }
 0x45d   : > { %v1463_v15 = vadd.f32 %v1454_v26, %v1402_v63 }
 0x45f   : > { %v1491_v9 = vadd.f32 %v2779_v41, %v1463_v15 }
 0x461   : > { %v1495_v13 = vmul.f32 %v1491_v9, %v2723_v47 }
 0x462   : > { %v1369_v62 = vpop.f32.mrf.mxu1 }
 0x463   : > { %v1405_v28 = vadd.f32 %v1404_v61, %v1369_v62  ;;  %v1702_v61 = vpop.permute.xlu2 %1701 }
 0x464   : > { %v1457_v25 = vpop.f32.mrf.mxu2 }
 0x465   : > { %v1464_v0 = vadd.f32 %v1457_v25, %v1405_v28  ;;  %v1697_v28 = vpop.permute.xlu1 %1696 }
 0x467   : > { %v1492_v1 = vadd.f32 %v2777_v36, %v1464_v0  ;;  %v1499_v36 = vmax.f32 %v1495_v13, 0.0 }
 0x469   : > { %v1496_v11 = vmul.f32 %v1492_v1, %v2723_v47  ;;  %v1502_v41 = vpack.c.bf16 %v1499_v36, %v1498_v23 }
 0x46a   : > { %v1371_v3 = vpop.f32.mrf.mxu1 }
 0x46b   : > { %v1407_v5 = vadd.f32 %v1406_v2, %v1371_v3  ;;  %v1500_v37 = vmax.f32 %v1496_v11, 0.0 }
 0x46c   : > { %v1459_v6 = vpop.f32.mrf.mxu2 }
 0x46d   : > { %v1465_v48 = vadd.f32 %v1459_v6, %v1407_v5 }
 0x46f   : > { %v1493_v12 = vadd.f32 %v2781_v42, %v1465_v48  ;;  %v2195_v42 = vld [vmem:[%s2938_s8 + $0x28] sm:$0xff] }
 0x471   : > { %v1497_v34 = vmul.f32 %v1493_v12, %v2723_v47  ;;  %v2191_v47 = vld [vmem:[%s2938_s8 + $0x14] sm:$0xff] }
 0x473   : > { %v1501_v33 = vmax.f32 %v1497_v34, 0.0 }
 0x475   : > { %v1503_v7 = vpack.c.bf16 %v1501_v33, %v1500_v37 }
 0x477   : > { %1542 = vmatpush.bf16.msrb.mxu3 %v1503_v7  ;;  %1602 = vmatpush.bf16.msra.mxu1 %v1503_v7 }
 0x478   : > { %1652 = vmatpush.bf16.msrb.mxu0 %v1503_v7 }
 0x47b   : > { %1543 = vmatpush.bf16.msrb.mxu3 %v1502_v41  ;;  %1603 = vmatpush.bf16.msra.mxu1 %v1502_v41 }
 0x47c   : > { %1653 = vmatpush.bf16.msrb.mxu0 %v1502_v41 }
 0x47e   : > { %2127 = vmatmul.msk.bf16.vlgmr.msrb.gmra.mxu3 %vm535_vm0, %v2193_v60  ;;  %2138 = vmatmul.msk.bf16.vlgmr.msra.gmra.mxu1 %vm535_vm0, %v2191_v47 }
 0x47f   : > { %2154 = vmatmul.msk.bf16.vlgmr.msrb.gmra.mxu0 %vm535_vm0, %v2195_v42 }
 0x48e   : > { %2128 = vmatmul.msk.bf16.gmra.mxu3 %vm535_vm0, %v2194_v29  ;;  %2139 = vmatmul.msk.bf16.gmra.mxu1 %vm535_vm0, %v2192_v39 }
 0x48f   : > { %2155 = vmatmul.msk.bf16.gmra.mxu0 %vm535_vm0, %v2196_v19 }
 0x49e   : > { %2129 = vmatmul.msk.bf16.gmra.mxu3 %vm535_vm0, %v1526_v38  ;;  %2140 = vmatmul.msk.bf16.gmra.mxu1 %vm535_vm0, %v1586_v44 }
 0x49f   : > { %2156 = vmatmul.msk.bf16.gmra.mxu0 %vm535_vm0, %v1636_v22 }
 0x4fb   : > { %v1605_v16 = vpop.f32.mrf.mxu1 }
 0x4fc   : > { %v1655_v45 = vpop.f32.mrf.mxu0 }
 0x4fd   : > { %1669 = vrot.lane.b32.xlu2 %v1655_v45, %s2396_s19 }
 0x501   : > { %v1545_v46 = vpop.f32.mrf.mxu3 }
 0x502   : > { %1559 = vrot.lane.b32.xlu0 %v1545_v46, %s2395_s18 }
 0x503   : > { %v1607_v59 = vpop.f32.mrf.mxu1 }
 0x504   : > { %v1657_v49 = vpop.f32.mrf.mxu0 }
 0x509   : > { %v1547_v53 = vpop.f32.mrf.mxu3 }
 0x50a   : > { %1561 = vrot.lane.b32.xlu1 %v1547_v53, %s2395_s18  ;;  %1671 = vrot.lane.b32.xlu0 %v1657_v49, %s2396_s19 }
 0x50b   : > { %v1610_v17 = vpop.f32.mrf.mxu1 }
 0x50c   : > { %v1660_v51 = vpop.f32.mrf.mxu0 }
 0x511   : > { %v1550_v52 = vpop.f32.mrf.mxu3 }
 0x512   : > { %1563 = vrot.lane.b32.xlu2 %v1550_v52, %s2395_s18  ;;  %1673 = vrot.lane.b32.xlu1 %v1660_v51, %s2396_s19 }
 0x513   : > { %v1612_v26 = vpop.f32.mrf.mxu1 }
 0x514   : > { %v1662_v55 = vpop.f32.mrf.mxu0 }
 0x519   : > { %v1552_v18 = vpop.f32.mrf.mxu3 }
 0x51a   : > { %1675 = vrot.lane.b32.xlu2 %v1662_v55, %s2396_s19  ;;  %1565 = vrot.lane.b32.xlu0 %v1552_v18, %s2395_s18 }
 0x51b   : > { %v1615_v62 = vpop.f32.mrf.mxu1 }
 0x51c   : > { %v1665_v56 = vpop.f32.mrf.mxu0 }
 0x521   : > { %v1555_v50 = vpop.f32.mrf.mxu3 }
 0x522   : > { %1716 = vperm.xlu2 %2252, %v1693_v57   ;;  %1677 = vrot.lane.b32.xlu0 %v1665_v56, %s2396_s19 }
 0x523   : > { %1567 = vrot.lane.b32.xlu1 %v1555_v50, %s2395_s18  ;;  %v1617_v2 = vpop.f32.mrf.mxu1 }
 0x524   : > { %v1667_v54 = vpop.f32.mrf.mxu0 }
 0x529   : > { %v1557_v58 = vpop.f32.mrf.mxu3 }
 0x52a   : > { %1706 = vperm.xlu0 %2253, %v2750_v8  }
 0x52b   : > { %1711 = vperm.xlu1 %2254, %v2771_v14   ;;  %v1724_v14 = vperm.slane %v2720_v43, 1 }
 0x557   : > { %v1670_v25 = vpop.permute.xlu2 %1669 }
 0x558   : > { %v1679_v15 = vsel %vm497_vm3, %v1670_v25, 0.0 }
 0x56c   : > { %v1564_v13 = vpop.permute.xlu2 %1563 }
 0x56d   : > { %v1571_v41 = vsel %vm496_vm1, %v1564_v13, 0.0 }
 0x56e   : > { %v1611_v21 = vadd.f32 %v1610_v17, %v1571_v41 }
 0x574   : > { %v1560_v63 = vpop.permute.xlu0 %1559  ;;  %v1676_v33 = vpop.permute.xlu2 %1675 }
 0x575   : > { %v1569_v27 = vsel %vm496_vm1, %v1560_v63, 0.0  ;;  %v1682_v30 = vsel %vm497_vm3, %v1676_v33, 0.0 }
 0x576   : > { %v1606_v0 = vadd.f32 %v1605_v16, %v1569_v27 }
 0x578   : > { %v1684_v8 = vadd.f32 %v1679_v15, %v1606_v0 }
 0x57a   : > { %v1719_v3 = vadd.f32 %v1697_v28, %v1684_v8 }
 0x57c   : > { %v1725_v4 = vmul.f32 %v1724_v14, %v1719_v3  ;;  %v1562_v1 = vpop.permute.xlu1 %1561  ;;  %v1672_v6 = vpop.permute.xlu0 %1671 }
 0x57d   : > { %v1570_v5 = vsel %vm496_vm1, %v1562_v1, 0.0  ;;  %v1680_v43 = vsel %vm497_vm3, %v1672_v6, 0.0  ;;  %v1717_v24 = vpop.permute.xlu2 %1716 }
 0x57e   : > { %v1730_v9 = vmax.f32 %v1725_v4, 0.0  ;;  %v1608_v48 = vadd.f32 %v1607_v59, %v1570_v5 }
 0x580   : > { %1735 = vst [vmem:[%s2904_s26] sm:$0xff] %v1730_v9  ;;  %v1685_v20 = vadd.f32 %v1680_v43, %v1608_v48 }
 0x582   : > { %v1720_v11 = vadd.f32 %v1702_v61, %v1685_v20 }
 0x584   : > { %v1726_v12 = vmul.f32 %v1724_v14, %v1720_v11  ;;  %v1674_v37 = vpop.permute.xlu1 %1673 }
 0x585   : > { %v1681_v47 = vsel %vm497_vm3, %v1674_v37, 0.0 }
 0x586   : > { %v1731_v34 = vmax.f32 %v1726_v12, 0.0  ;;  %v1686_v38 = vadd.f32 %v1681_v47, %v1611_v21 }
 0x588   : > { %1736 = vst [vmem:[%s2904_s26 + $0x8] sm:$0xff] %v1731_v34 }
 0x58c   : > { %v1566_v35 = vpop.permute.xlu0 %1565 }
 0x58d   : > { %v1572_v7 = vsel %vm496_vm1, %v1566_v35, 0.0 }
 0x58e   : > { %v1613_v29 = vadd.f32 %v1612_v26, %v1572_v7 }
 0x590   : > { %v1687_v40 = vadd.f32 %v1682_v30, %v1613_v29 }
 0x594   : > { %v1678_v36 = vpop.permute.xlu0 %1677 }
 0x595   : > { %v1568_v23 = vpop.permute.xlu1 %1567  ;;  %v1683_v19 = vsel %vm497_vm3, %v1678_v36, 0.0 }
 0x596   : > { %v1573_v60 = vsel %vm496_vm1, %v1568_v23, 0.0 }
 0x597   : > { %v1616_v42 = vadd.f32 %v1615_v62, %v1573_v60 }
 0x599   : > { %v1688_v31 = vadd.f32 %v1683_v19, %v1616_v42 }
 0x59b   : > { %v1723_v22 = vadd.f32 %v1717_v24, %v1688_v31 }
 0x59c   : > { %v1707_v39 = vpop.permute.xlu0 %1706 }
 0x59d   : > { %v1729_v32 = vmul.f32 %v1724_v14, %v1723_v22  ;;  %v1721_v44 = vadd.f32 %v1707_v39, %v1686_v38  ;;  %v1712_v45 = vpop.permute.xlu1 %1711 }
 0x59e   : > { %v1722_v46 = vadd.f32 %v1712_v45, %v1687_v40 }
 0x59f   : > { %v1734_v49 = vmax.f32 %v1729_v32, 0.0  ;;  %v1727_v53 = vmul.f32 %v1724_v14, %v1721_v44 }
 0x5a0   : > { %v1728_v51 = vmul.f32 %v1724_v14, %v1722_v46 }
 0x5a1   : > { %1739 = vst [vmem:[%s2904_s26 + $0x20] sm:$0x3] %v1734_v49  ;;  %v1732_v52 = vmax.f32 %v1727_v53, 0.0 }
 0x5a2   : > { %v1733_v55 = vmax.f32 %v1728_v51, 0.0 }
 0x5a3   : > { %1737 = vst [vmem:[%s2904_s26 + $0x10] sm:$0xff] %v1732_v52 }
 0x5a4   : > { %1738 = vst [vmem:[%s2904_s26 + $0x18] sm:$0xff] %v1733_v55 }
 0x5a5 PF: > { %s24_s17 = sadd.s32 1, %s2389_s17  }
 0x5a6   : > { %p21_p7 = scmp.ge.s32.totalorder %s24_s17, 4  }
 0x5a8   :  { %23 = sbr.rel (!%p21_p7) target bundleno = 2 (0x2), region = 126 }
 0x5ad   :  { %1777 = vsyncpa [#allocation3], 1 }
 0x5ae   :  { %1779 = vsyncpa [#allocation3 + $0x1], 1 }
 0x5af   :  { %1780 = vsyncpa [#allocation5], 1 }

</bundles_post_ra>
